<compile_context>
chip_gen: v6e
topology: v6e:2x2x1
jax: 0.10.0
libtpu: 0.0.40
codegen_flags: <defaults>
</compile_context>

<pallas_src>
import math

import jax
import jax.numpy as jnp
from jax import lax
from jax.experimental import pallas as pl
from jax.experimental.pallas import tpu as pltpu


# ---------------------------------------------------------------------------
# Fused kernel: global token + multi-head attention pool for Bt batch elements
# ---------------------------------------------------------------------------
def attn_pool_kernel(pos_ref, gpos_ref, sel_ref, selt_ref, x_ref,
                     wqkv_ref, wk_t_ref, wv_t_ref, wc_t_ref, bc_ref, out_ref):
    f32 = jnp.float32

    x_cf = x_ref[...]                                   # (Bt, C, HW) channels-first
    bt, c, hw = x_cf.shape

    # ---- global token straight from the channels-first layout (lane reduction) ----
    g = jnp.mean(x_cf, axis=2)                          # (Bt, C)
    g_pos = g + gpos_ref[...]                           # (Bt, C)

    # fused global-token projection; 1/sqrt(head_dim) already folded into Wq columns
    # (no bias: matches in_proj_bias=None in the reference forward)
    qkv_g = jnp.dot(g_pos, wqkv_ref[...], preferred_element_type=f32)   # (Bt, 3C)
    q = qkv_g[:, :c]                                    # (Bt, C) pre-scaled query
    k_g = qkv_g[:, c:2 * c]                             # (Bt, C)
    v_g = qkv_g[:, 2 * c:]                              # (Bt, C)

    # ---- spatial tokens: channels-first -> channels-last on the XLU (has slack) ----
    x_t = jnp.transpose(x_cf, (0, 2, 1))                # (Bt, HW, C)
    x_pos = x_t + pos_ref[...][None, :, :]              # add resident pos-emb (HW, C)

    x2 = x_pos.reshape(bt * hw, c)
    k_s = jnp.dot(x2, wk_t_ref[...],
                  preferred_element_type=f32).reshape(bt, hw, c)        # (Bt, HW, C)
    v_s = jnp.dot(x2, wv_t_ref[...],
                  preferred_element_type=f32).reshape(bt, hw, c)        # (Bt, HW, C)

    sel = sel_ref[...]                                  # (C, nh) resident selector
    sel_t = selt_ref[...]                               # (nh, C)
    nh = sel.shape[1]

    # ---- per-head scores: s[b, l, h] = sum_{d in head h} q[b, d] * k[b, l, d] ----
    s_s = jnp.dot((k_s * q[:, None, :]).reshape(bt * hw, c), sel,
                  preferred_element_type=f32).reshape(bt, hw, nh)       # (Bt, HW, nh)
    s_g = jnp.dot(k_g * q, sel, preferred_element_type=f32)             # (Bt, nh)

    # softmax over the (1 global + HW spatial) tokens, per batch and head
    m = jnp.maximum(jnp.max(s_s, axis=1), s_g)                          # (Bt, nh)
    p_s = jnp.exp(s_s - m[:, None, :])                                  # (Bt, HW, nh)
    p_g = jnp.exp(s_g - m)                                              # (Bt, nh)
    denom = jnp.sum(p_s, axis=1) + p_g                                  # (Bt, nh)
    # exact reciprocal on a tiny (Bt, nh) array; approx EUP reciprocal would risk
    # the 1e-4 correctness tolerance for no measurable gain here.
    inv = 1.0 / denom

    # ---- weighted value sum: expand per-head weights back to channel width ----
    p_s_c = jnp.dot(p_s.reshape(bt * hw, nh), sel_t,
                    preferred_element_type=f32).reshape(bt, hw, c)      # (Bt, HW, C)
    o = jnp.sum(p_s_c * v_s, axis=1)                                    # (Bt, C)
    o = o + jnp.dot(p_g, sel_t, preferred_element_type=f32) * v_g
    o = o * jnp.dot(inv, sel_t, preferred_element_type=f32)

    # ---- output projection (c_proj weight + bias) ----
    out_ref[0] = jnp.dot(o, wc_t_ref[...], preferred_element_type=f32) + bc_ref[...]


# ---------------------------------------------------------------------------
# Host-side (tiny, grid-invariant) precomputes
# ---------------------------------------------------------------------------
def _fourier_pos_embed(params, H, W):
    """Fourier features -> LayerNorm -> Linear for the spatial grid: (HW, C)."""
    HW = H * W
    grid_y = jnp.linspace(0.0, 1.0, H)
    grid_x = jnp.linspace(0.0, 1.0, W)
    yy, xx = jnp.meshgrid(grid_y, grid_x, indexing="ij")
    coords = jnp.stack([xx, yy], axis=-1).reshape(HW, 2).astype(jnp.float32)
    proj = (2.0 * jnp.pi) * coords @ params["fourier_B"].astype(jnp.float32)
    feats = jnp.concatenate([jnp.sin(proj), jnp.cos(proj)], axis=-1)
    mu = jnp.mean(feats, axis=-1, keepdims=True)
    var = jnp.mean(jnp.square(feats - mu), axis=-1, keepdims=True)
    feats = (feats - mu) * lax.rsqrt(var + 1e-5)                 # LayerNorm (eps=1e-5)
    feats = feats * params["ln_gamma"].astype(jnp.float32) + params["ln_beta"].astype(jnp.float32)
    return feats @ params["wp"].T.astype(jnp.float32) + params["bp"].astype(jnp.float32)


def _plan_batch_tiles(B, hw, c, *, target_block_bytes=2 << 20, cap=256):
    """Pick (Bt, nsteps): ~1-4 MiB x-blocks, >= 4 grid steps when the batch allows,
    and an even step count (v7x: 2 TensorCores x >= 2 pipelined steps each).
    The padded batch is Bt * nsteps (>= B); extra rows are zero-padded."""
    per_elem = hw * c * 4
    bt = int(max(1, min(cap, target_block_bytes // max(per_elem, 1))))
    bt = min(bt, max(1, B // 4))          # keep >= 4 grid steps when B allows
    nsteps = -(-B // bt)
    if nsteps > 1 and nsteps % 2:         # even steps for v7x megacore balance,
        nsteps += 1                       # re-shrink Bt to minimize padding
        bt = -(-B // nsteps)
    return bt, nsteps


# ---------------------------------------------------------------------------
# Wrapper
# ---------------------------------------------------------------------------
def attention_pool2d(x_nchw, params, num_heads, *, batch_tile=None):
    B, C, H, W = x_nchw.shape
    HW = H * W
    O = params["wc"].shape[0]
    hd = C // num_heads
    scale = 1.0 / math.sqrt(hd)

    # NCHW -> (B, C, HW): pure minor-dim merge, NO extra HBM transpose pass.
    x_cf = x_nchw.reshape(B, C, HW).astype(jnp.float32)

    # Grid-invariant precomputes (tiny, fused by XLA; resident operands in VMEM).
    pos_s = _fourier_pos_embed(params, H, W)                         # (HW, C)
    gpos = params["global_pos"][None, :].astype(jnp.float32)         # (1, C)
    w_qkv = jnp.concatenate(
        [params["wq"].T * scale, params["wk"].T, params["wv"].T],    # scale folded in
        axis=1).astype(jnp.float32)                                  # (C, 3C)
    wk_t = params["wk"].T.astype(jnp.float32)                        # (C, C)
    wv_t = params["wv"].T.astype(jnp.float32)                        # (C, C)
    wc_t = params["wc"].T.astype(jnp.float32)                        # (C, O)
    bc = params["bc"][None, :].astype(jnp.float32)                   # (1, O)
    head_of = jnp.arange(C) // hd
    sel = (head_of[:, None] == jnp.arange(num_heads)[None, :]).astype(jnp.float32)
    sel_t = sel.T                                                    # (nh, C)

    if batch_tile is not None:
        Bt = int(batch_tile)
        nsteps = -(-B // Bt)
        if nsteps > 1 and nsteps % 2:
            nsteps += 1
    else:
        Bt, nsteps = _plan_batch_tiles(B, HW, C)
    Bp = Bt * nsteps
    if Bp != B:
        # Zero-pad the batch (padded rows produce finite garbage, sliced off below).
        x_cf = jnp.pad(x_cf, ((0, Bp - B), (0, 0), (0, 0)))

    out = pl.pallas_call(
        attn_pool_kernel,
        out_shape=jax.ShapeDtypeStruct((nsteps, Bt, O), jnp.float32),
        grid=(nsteps,),
        in_specs=[
            pl.BlockSpec((HW, C), lambda b: (0, 0)),            # pos_s (resident)
            pl.BlockSpec((1, C), lambda b: (0, 0)),             # global_pos
            pl.BlockSpec((C, num_heads), lambda b: (0, 0)),     # sel
            pl.BlockSpec((num_heads, C), lambda b: (0, 0)),     # sel_t
            pl.BlockSpec((Bt, C, HW), lambda b: (b, 0, 0)),     # x (channels-first tile)
            pl.BlockSpec((C, 3 * C), lambda b: (0, 0)),         # [Wq^T*scale | Wk^T | Wv^T]
            pl.BlockSpec((C, C), lambda b: (0, 0)),             # Wk^T
            pl.BlockSpec((C, C), lambda b: (0, 0)),             # Wv^T
            pl.BlockSpec((C, O), lambda b: (0, 0)),             # Wc^T
            pl.BlockSpec((1, O), lambda b: (0, 0)),             # bc
        ],
        out_specs=pl.BlockSpec((1, Bt, O), lambda b: (b, 0, 0)),
        compiler_params=pltpu.CompilerParams(
            dimension_semantics=("parallel",),
            vmem_limit_bytes=32 * 1024 * 1024),
    )(pos_s, gpos, sel, sel_t, x_cf, w_qkv, wk_t, wv_t, wc_t, bc)
    return out.reshape(Bp, O)[:B]


# ---------------------------------------------------------------------------
# Pure-JAX reference (mirrors the PyTorch forward) for correctness checking
# ---------------------------------------------------------------------------
def reference(x_nchw, params, num_heads):
    B, C, H, W = x_nchw.shape
    HW = H * W
    x = jnp.transpose(x_nchw.reshape(B, C, HW), (2, 0, 1))   # (HW, B, C)
    g = jnp.mean(x, axis=0, keepdims=True)
    x = jnp.concatenate([g, x], axis=0)                      # (L, B, C)
    L = HW + 1

    grid_y = jnp.linspace(0.0, 1.0, H)
    grid_x = jnp.linspace(0.0, 1.0, W)
    yy, xx = jnp.meshgrid(grid_y, grid_x, indexing="ij")
    coords = jnp.stack([xx, yy], axis=-1).reshape(HW, 2)
    proj = 2.0 * jnp.pi * coords @ params["fourier_B"]
    feats = jnp.concatenate([jnp.sin(proj), jnp.cos(proj)], axis=-1)
    mu = feats.mean(-1, keepdims=True)
    var = ((feats - mu) ** 2).mean(-1, keepdims=True)
    feats = (feats - mu) / jnp.sqrt(var + 1e-5) * params["ln_gamma"] + params["ln_beta"]
    pos_spatial = feats @ params["wp"].T + params["bp"]
    pos = jnp.concatenate([params["global_pos"][None, :], pos_spatial], axis=0)
    x = x + pos[:, None, :]

    q = x[:1] @ params["wq"].T
    k = x @ params["wk"].T
    v = x @ params["wv"].T
    hd = C // num_heads
    qh = q.reshape(1, B, num_heads, hd)
    kh = k.reshape(L, B, num_heads, hd)
    vh = v.reshape(L, B, num_heads, hd)
    s = jnp.einsum("qbhd,kbhd->bhqk", qh, kh) / math.sqrt(hd)
    a = jax.nn.softmax(s, axis=-1)
    o = jnp.einsum("bhqk,kbhd->qbhd", a, vh).reshape(1, B, C)
    out = o @ params["wc"].T + params["bc"]
    return out[0]


# ---------------------------------------------------------------------------
if __name__ == "__main__":
    embed_dim = 64
    num_heads = 4
    fourier_size = 64
    output_dim = embed_dim
    B, H, W = 16, 8, 8

    key = jax.random.PRNGKey(0)
    ks = jax.random.split(key, 10)
    params = dict(
        fourier_B=jax.random.normal(ks[0], (2, fourier_size // 2), jnp.float32),
        ln_gamma=jnp.ones((fourier_size,), jnp.float32),
        ln_beta=jnp.zeros((fourier_size,), jnp.float32),
        wp=jax.random.normal(ks[1], (embed_dim, fourier_size), jnp.float32) * 0.05,
        bp=jax.random.normal(ks[2], (embed_dim,), jnp.float32) * 0.05,
        global_pos=jax.random.normal(ks[3], (embed_dim,), jnp.float32) * 0.05,
        wq=jax.random.normal(ks[4], (embed_dim, embed_dim), jnp.float32) * 0.05,
        wk=jax.random.normal(ks[5], (embed_dim, embed_dim), jnp.float32) * 0.05,
        wv=jax.random.normal(ks[6], (embed_dim, embed_dim), jnp.float32) * 0.05,
        wc=jax.random.normal(ks[7], (output_dim, embed_dim), jnp.float32) * 0.05,
        bc=jax.random.normal(ks[8], (output_dim,), jnp.float32) * 0.05,
    )
    x = jax.random.normal(ks[9], (B, embed_dim, H, W), jnp.float32)

    out = jax.block_until_ready(attention_pool2d(x, params, num_heads))
    ref = jax.block_until_ready(reference(x, params, num_heads))

    assert out.shape == (B, output_dim), out.shape
    assert jnp.allclose(out, ref, atol=1e-4, rtol=1e-4), float(jnp.max(jnp.abs(out - ref)))
    print("KERNEL_OK")
</pallas_src>

<mosaic_0001>
module attributes {stable_mosaic.version = 11 : i64} {
  func.func @attn_pool_kernel(%arg0: i32, %arg1: memref<64x64xf32, #tpu.memory_space<vmem>>, %arg2: memref<1x64xf32, #tpu.memory_space<vmem>>, %arg3: memref<64x4xf32, #tpu.memory_space<vmem>>, %arg4: memref<4x64xf32, #tpu.memory_space<vmem>>, %arg5: memref<4x64x64xf32, #tpu.memory_space<vmem>>, %arg6: memref<64x192xf32, #tpu.memory_space<vmem>>, %arg7: memref<64x64xf32, #tpu.memory_space<vmem>>, %arg8: memref<64x64xf32, #tpu.memory_space<vmem>>, %arg9: memref<64x64xf32, #tpu.memory_space<vmem>>, %arg10: memref<1x64xf32, #tpu.memory_space<vmem>>, %arg11: memref<1x4x64xf32, #tpu.memory_space<vmem>>) attributes {dimension_semantics = [#tpu.dimension_semantics<parallel>], iteration_bounds = array<i64: 4>, scalar_prefetch = 0 : i64, scratch_operands = 0 : i64, tpu.core_type = #tpu.core_type<tc>, window_params = [{pipeline_mode = #tpu.pipeline_mode<synchronous>, transform_indices = @transform_0, window_bounds = array<i64: 64, 64>}, {pipeline_mode = #tpu.pipeline_mode<synchronous>, transform_indices = @transform_1, window_bounds = array<i64: 1, 64>}, {pipeline_mode = #tpu.pipeline_mode<synchronous>, transform_indices = @transform_2, window_bounds = array<i64: 64, 4>}, {pipeline_mode = #tpu.pipeline_mode<synchronous>, transform_indices = @transform_3, window_bounds = array<i64: 4, 64>}, {transform_indices = @transform_4, window_bounds = array<i64: 4, 64, 64>}, {pipeline_mode = #tpu.pipeline_mode<synchronous>, transform_indices = @transform_5, window_bounds = array<i64: 64, 192>}, {pipeline_mode = #tpu.pipeline_mode<synchronous>, transform_indices = @transform_6, window_bounds = array<i64: 64, 64>}, {pipeline_mode = #tpu.pipeline_mode<synchronous>, transform_indices = @transform_7, window_bounds = array<i64: 64, 64>}, {pipeline_mode = #tpu.pipeline_mode<synchronous>, transform_indices = @transform_8, window_bounds = array<i64: 64, 64>}, {pipeline_mode = #tpu.pipeline_mode<synchronous>, transform_indices = @transform_9, window_bounds = array<i64: 1, 64>}, {transform_indices = @transform_10, window_bounds = array<i64: 1, 4, 64>}]} {
    %c0 = arith.constant 0 : index
    %c0_0 = arith.constant 0 : index
    %c0_1 = arith.constant 0 : index
    %0 = vector.load %arg5[%c0, %c0_0, %c0_1] : memref<4x64x64xf32, #tpu.memory_space<vmem>>, vector<4x64x64xf32>
    %cst = arith.constant dense<0.000000e+00> : vector<4x64xf32>
    %1 = vector.multi_reduction <add>, %0, %cst [2] : vector<4x64x64xf32> to vector<4x64xf32>
    %cst_2 = arith.constant 6.400000e+01 : f32
    %2 = vector.broadcast %cst_2 : f32 to vector<4x64xf32>
    %3 = arith.divf %1, %2 : vector<4x64xf32>
    %c0_3 = arith.constant 0 : index
    %c0_4 = arith.constant 0 : index
    %4 = vector.load %arg2[%c0_3, %c0_4] : memref<1x64xf32, #tpu.memory_space<vmem>>, vector<1x64xf32>
    %5 = vector.broadcast %4 : vector<1x64xf32> to vector<4x64xf32>
    %6 = arith.addf %3, %5 : vector<4x64xf32>
    %c0_5 = arith.constant 0 : index
    %c0_6 = arith.constant 0 : index
    %7 = vector.load %arg6[%c0_5, %c0_6] : memref<64x192xf32, #tpu.memory_space<vmem>>, vector<64x192xf32>
    %cst_7 = arith.constant dense<0.000000e+00> : vector<4x192xf32>
    %8 = tpu.matmul %6, %7, %cst_7 {dimension_numbers = #tpu.dot_dimension_numbers<[1], [0], [0], [1], [0, 0, 1, 1], [], []>} : vector<4x64xf32>, vector<64x192xf32>, vector<4x192xf32> -> vector<4x192xf32>
    %9 = vector.extract_strided_slice %8 {offsets = [0, 0], sizes = [4, 64], strides = [1, 1]} : vector<4x192xf32> to vector<4x64xf32>
    %10 = vector.extract_strided_slice %8 {offsets = [0, 64], sizes = [4, 64], strides = [1, 1]} : vector<4x192xf32> to vector<4x64xf32>
    %11 = vector.extract_strided_slice %8 {offsets = [0, 128], sizes = [4, 64], strides = [1, 1]} : vector<4x192xf32> to vector<4x64xf32>
    %12 = tpu.transpose %0, [0, 2, 1] : vector<4x64x64xf32> -> vector<4x64x64xf32>
    %c0_8 = arith.constant 0 : index
    %c0_9 = arith.constant 0 : index
    %13 = vector.load %arg1[%c0_8, %c0_9] : memref<64x64xf32, #tpu.memory_space<vmem>>, vector<64x64xf32>
    %14 = vector.shape_cast %13 : vector<64x64xf32> to vector<1x64x64xf32>
    %15 = vector.broadcast %14 : vector<1x64x64xf32> to vector<4x64x64xf32>
    %16 = arith.addf %12, %15 : vector<4x64x64xf32>
    %17 = vector.shape_cast %16 : vector<4x64x64xf32> to vector<256x64xf32>
    %c0_10 = arith.constant 0 : index
    %c0_11 = arith.constant 0 : index
    %18 = vector.load %arg7[%c0_10, %c0_11] : memref<64x64xf32, #tpu.memory_space<vmem>>, vector<64x64xf32>
    %cst_12 = arith.constant dense<0.000000e+00> : vector<256x64xf32>
    %19 = tpu.matmul %17, %18, %cst_12 {dimension_numbers = #tpu.dot_dimension_numbers<[1], [0], [0], [1], [0, 0, 1, 1], [], []>} : vector<256x64xf32>, vector<64x64xf32>, vector<256x64xf32> -> vector<256x64xf32>
    %20 = vector.shape_cast %19 : vector<256x64xf32> to vector<4x64x64xf32>
    %c0_13 = arith.constant 0 : index
    %c0_14 = arith.constant 0 : index
    %21 = vector.load %arg8[%c0_13, %c0_14] : memref<64x64xf32, #tpu.memory_space<vmem>>, vector<64x64xf32>
    %cst_15 = arith.constant dense<0.000000e+00> : vector<256x64xf32>
    %22 = tpu.matmul %17, %21, %cst_15 {dimension_numbers = #tpu.dot_dimension_numbers<[1], [0], [0], [1], [0, 0, 1, 1], [], []>} : vector<256x64xf32>, vector<64x64xf32>, vector<256x64xf32> -> vector<256x64xf32>
    %23 = vector.shape_cast %22 : vector<256x64xf32> to vector<4x64x64xf32>
    %c0_16 = arith.constant 0 : index
    %c0_17 = arith.constant 0 : index
    %24 = vector.load %arg3[%c0_16, %c0_17] : memref<64x4xf32, #tpu.memory_space<vmem>>, vector<64x4xf32>
    %c0_18 = arith.constant 0 : index
    %c0_19 = arith.constant 0 : index
    %25 = vector.load %arg4[%c0_18, %c0_19] : memref<4x64xf32, #tpu.memory_space<vmem>>, vector<4x64xf32>
    %26 = vector.shape_cast %9 : vector<4x64xf32> to vector<4x1x64xf32>
    %27 = vector.broadcast %26 : vector<4x1x64xf32> to vector<4x64x64xf32>
    %28 = arith.mulf %20, %27 : vector<4x64x64xf32>
    %29 = vector.shape_cast %28 : vector<4x64x64xf32> to vector<256x64xf32>
    %cst_20 = arith.constant dense<0.000000e+00> : vector<256x4xf32>
    %30 = tpu.matmul %29, %24, %cst_20 {dimension_numbers = #tpu.dot_dimension_numbers<[1], [0], [0], [1], [0, 0, 1, 1], [], []>} : vector<256x64xf32>, vector<64x4xf32>, vector<256x4xf32> -> vector<256x4xf32>
    %31 = vector.shape_cast %30 : vector<256x4xf32> to vector<4x64x4xf32>
    %32 = arith.mulf %10, %9 : vector<4x64xf32>
    %cst_21 = arith.constant dense<0.000000e+00> : vector<4x4xf32>
    %33 = tpu.matmul %32, %24, %cst_21 {dimension_numbers = #tpu.dot_dimension_numbers<[1], [0], [0], [1], [0, 0, 1, 1], [], []>} : vector<4x64xf32>, vector<64x4xf32>, vector<4x4xf32> -> vector<4x4xf32>
    %cst_22 = arith.constant dense<0xFF800000> : vector<4x4xf32>
    %34 = vector.multi_reduction <maximumf>, %31, %cst_22 [1] : vector<4x64x4xf32> to vector<4x4xf32>
    %35 = arith.maximumf %34, %33 : vector<4x4xf32>
    %36 = vector.shape_cast %35 : vector<4x4xf32> to vector<4x1x4xf32>
    %37 = vector.broadcast %36 : vector<4x1x4xf32> to vector<4x64x4xf32>
    %38 = arith.subf %31, %37 : vector<4x64x4xf32>
    %39 = math.exp %38 : vector<4x64x4xf32>
    %40 = arith.subf %33, %35 : vector<4x4xf32>
    %41 = math.exp %40 : vector<4x4xf32>
    %cst_23 = arith.constant dense<0.000000e+00> : vector<4x4xf32>
    %42 = vector.multi_reduction <add>, %39, %cst_23 [1] : vector<4x64x4xf32> to vector<4x4xf32>
    %43 = arith.addf %42, %41 : vector<4x4xf32>
    %cst_24 = arith.constant 1.000000e+00 : f32
    %44 = vector.broadcast %cst_24 : f32 to vector<4x4xf32>
    %45 = arith.divf %44, %43 : vector<4x4xf32>
    %46 = vector.shape_cast %39 : vector<4x64x4xf32> to vector<256x4xf32>
    %cst_25 = arith.constant dense<0.000000e+00> : vector<256x64xf32>
    %47 = tpu.matmul %46, %25, %cst_25 {dimension_numbers = #tpu.dot_dimension_numbers<[1], [0], [0], [1], [0, 0, 1, 1], [], []>} : vector<256x4xf32>, vector<4x64xf32>, vector<256x64xf32> -> vector<256x64xf32>
    %48 = vector.shape_cast %47 : vector<256x64xf32> to vector<4x64x64xf32>
    %49 = arith.mulf %48, %23 : vector<4x64x64xf32>
    %cst_26 = arith.constant dense<0.000000e+00> : vector<4x64xf32>
    %50 = vector.multi_reduction <add>, %49, %cst_26 [1] : vector<4x64x64xf32> to vector<4x64xf32>
    %cst_27 = arith.constant dense<0.000000e+00> : vector<4x64xf32>
    %51 = tpu.matmul %41, %25, %cst_27 {dimension_numbers = #tpu.dot_dimension_numbers<[1], [0], [0], [1], [0, 0, 1, 1], [], []>} : vector<4x4xf32>, vector<4x64xf32>, vector<4x64xf32> -> vector<4x64xf32>
    %52 = arith.mulf %51, %11 : vector<4x64xf32>
    %53 = arith.addf %50, %52 : vector<4x64xf32>
    %cst_28 = arith.constant dense<0.000000e+00> : vector<4x64xf32>
    %54 = tpu.matmul %45, %25, %cst_28 {dimension_numbers = #tpu.dot_dimension_numbers<[1], [0], [0], [1], [0, 0, 1, 1], [], []>} : vector<4x4xf32>, vector<4x64xf32>, vector<4x64xf32> -> vector<4x64xf32>
    %55 = arith.mulf %53, %54 : vector<4x64xf32>
    %c0_29 = arith.constant 0 : index
    %c0_30 = arith.constant 0 : index
    %56 = vector.load %arg9[%c0_29, %c0_30] : memref<64x64xf32, #tpu.memory_space<vmem>>, vector<64x64xf32>
    %cst_31 = arith.constant dense<0.000000e+00> : vector<4x64xf32>
    %57 = tpu.matmul %55, %56, %cst_31 {dimension_numbers = #tpu.dot_dimension_numbers<[1], [0], [0], [1], [0, 0, 1, 1], [], []>} : vector<4x64xf32>, vector<64x64xf32>, vector<4x64xf32> -> vector<4x64xf32>
    %c0_32 = arith.constant 0 : index
    %c0_33 = arith.constant 0 : index
    %58 = vector.load %arg10[%c0_32, %c0_33] : memref<1x64xf32, #tpu.memory_space<vmem>>, vector<1x64xf32>
    %59 = vector.broadcast %58 : vector<1x64xf32> to vector<4x64xf32>
    %60 = arith.addf %57, %59 : vector<4x64xf32>
    %c0_34 = arith.constant 0 : index
    %c0_35 = arith.constant 0 : index
    %c0_36 = arith.constant 0 : index
    %61 = vector.load %arg11[%c0_34, %c0_35, %c0_36] : memref<1x4x64xf32, #tpu.memory_space<vmem>>, vector<1x4x64xf32>
    %62 = vector.shape_cast %61 : vector<1x4x64xf32> to vector<4x64xf32>
    %63 = vector.shape_cast %60 : vector<4x64xf32> to vector<1x4x64xf32>
    tpu.vector_store %arg11[%c0_34, %c0_35, %c0_36], %63 {strides = array<i32>} : memref<1x4x64xf32, #tpu.memory_space<vmem>>, vector<1x4x64xf32>,
    return
  }
  func.func @transform_0(%arg0: i32) -> (i32, i32) {
    %c0_i32 = arith.constant 0 : i32
    %c0_i32_0 = arith.constant 0 : i32
    %c0_i32_1 = arith.constant 0 : i32
    return %c0_i32, %c0_i32_0 : i32, i32
  }
  func.func @transform_1(%arg0: i32) -> (i32, i32) {
    %c0_i32 = arith.constant 0 : i32
    %c0_i32_0 = arith.constant 0 : i32
    %c0_i32_1 = arith.constant 0 : i32
    return %c0_i32, %c0_i32_0 : i32, i32
  }
  func.func @transform_2(%arg0: i32) -> (i32, i32) {
    %c0_i32 = arith.constant 0 : i32
    %c0_i32_0 = arith.constant 0 : i32
    %c0_i32_1 = arith.constant 0 : i32
    return %c0_i32, %c0_i32_0 : i32, i32
  }
  func.func @transform_3(%arg0: i32) -> (i32, i32) {
    %c0_i32 = arith.constant 0 : i32
    %c0_i32_0 = arith.constant 0 : i32
    %c0_i32_1 = arith.constant 0 : i32
    return %c0_i32, %c0_i32_0 : i32, i32
  }
  func.func @transform_4(%arg0: i32) -> (i32, i32, i32) {
    %c0_i32 = arith.constant 0 : i32
    %c0_i32_0 = arith.constant 0 : i32
    %c0_i32_1 = arith.constant 0 : i32
    return %arg0, %c0_i32, %c0_i32_0 : i32, i32, i32
  }
  func.func @transform_5(%arg0: i32) -> (i32, i32) {
    %c0_i32 = arith.constant 0 : i32
    %c0_i32_0 = arith.constant 0 : i32
    %c0_i32_1 = arith.constant 0 : i32
    return %c0_i32, %c0_i32_0 : i32, i32
  }
  func.func @transform_6(%arg0: i32) -> (i32, i32) {
    %c0_i32 = arith.constant 0 : i32
    %c0_i32_0 = arith.constant 0 : i32
    %c0_i32_1 = arith.constant 0 : i32
    return %c0_i32, %c0_i32_0 : i32, i32
  }
  func.func @transform_7(%arg0: i32) -> (i32, i32) {
    %c0_i32 = arith.constant 0 : i32
    %c0_i32_0 = arith.constant 0 : i32
    %c0_i32_1 = arith.constant 0 : i32
    return %c0_i32, %c0_i32_0 : i32, i32
  }
  func.func @transform_8(%arg0: i32) -> (i32, i32) {
    %c0_i32 = arith.constant 0 : i32
    %c0_i32_0 = arith.constant 0 : i32
    %c0_i32_1 = arith.constant 0 : i32
    return %c0_i32, %c0_i32_0 : i32, i32
  }
  func.func @transform_9(%arg0: i32) -> (i32, i32) {
    %c0_i32 = arith.constant 0 : i32
    %c0_i32_0 = arith.constant 0 : i32
    %c0_i32_1 = arith.constant 0 : i32
    return %c0_i32, %c0_i32_0 : i32, i32
  }
  func.func @transform_10(%arg0: i32) -> (i32, i32, i32) {
    %c0_i32 = arith.constant 0 : i32
    %c0_i32_0 = arith.constant 0 : i32
    %c0_i32_1 = arith.constant 0 : i32
    return %arg0, %c0_i32, %c0_i32_0 : i32, i32, i32
  }
}

</mosaic_0001>

<bundles_post_ra>
// kernel: tpu_custom_call.1
= control target key start
LH: loop header
LB: loop body
LE: loop exit
PB: predicated region body
PF: predicated region fallthrough
CT: control target
= control target key end

     0   :  { %s5887_s0 = inlined_call_operand.vmem [shape: f32[64,64], index: 0, kind: input, shape index: {}]   ;;  %s5888_s1 = inlined_call_operand.vmem [shape: f32[1,64], index: 1, kind: input, shape index: {}]   ;;  %s5889_s2 = inlined_call_operand.vmem [shape: f32[64,4], index: 2, kind: input, shape index: {}]   ;;  %s5890_s3 = inlined_call_operand.vmem [shape: f32[4,64], index: 3, kind: input, shape index: {}]   ;;  %s5891_s4 = inlined_call_operand.hbm [shape: f32[16,64,64], index: 4, kind: input, shape index: {}]   ;;  %s5892_s5 = inlined_call_operand.hbm [shape: f32[64,192], index: 5, kind: input, shape index: {}]   ;;  %s5893_s6 = inlined_call_operand.hbm [shape: f32[64,64], index: 6, kind: input, shape index: {}]   ;;  %s5894_s7 = inlined_call_operand.hbm [shape: f32[64,64], index: 7, kind: input, shape index: {}]   ;;  %s5895_s8 = inlined_call_operand.hbm [shape: f32[64,64], index: 8, kind: input, shape index: {}]   ;;  %s5896_s9 = inlined_call_operand.vmem [shape: f32[1,64], index: 9, kind: input, shape index: {}]   ;;  %s5897_s10 = inlined_call_operand.hbm [shape: f32[4,4,64], index: 10, kind: output, shape index: {}]  }
   0x1   :  { %5922 = sst [smem:[#allocation42_spill]] %s5892_s5 }
   0x2   :  { %5923 = sst [smem:[#allocation43_spill]] %s5893_s6 }
   0x3   :  { %5924 = sst [smem:[#allocation44_spill]] %s5894_s7 }
   0x4   :  { %5925 = sst [smem:[#allocation45_spill]] %s5895_s8 }
   0x5   :  { %15 = vsyncpa [#allocation3], 0 }
   0x6   :  { %17 = vsyncpa [#allocation3 + $0x1], 0 }
   0x7   :  { %18 = vsyncpa [#allocation6], 0 }
   0x8   :  { %19 = vsyncpa [#allocation9], 0 }
   0x9   :  { %20 = vsyncpa [#allocation4], 0 }
   0xa   :  { %22 = vsyncpa [#allocation4 + $0x1], 0  ;;  %s4533_s13 = smov 0   ;;  %s4535_s14 = smov 0  }
   0xb   :  { %s4537_s15 = smov 0   ;;  %s4539_s16 = smov 0  }
   0xc LB: > { %s4554_s17 = sadd.s32 4294967295, %s4461_s16   ;;  %s3456_s18 = sadd.s32 4294967294, %s4461_s16   ;;  %s4461_s16 = sphi %s4539_s16, %s6035_s16   ;;  %s4457_s15 = sphi %s4537_s15, %s6034_s15   ;;  %s4453_s14 = sphi %s4535_s14, %s6033_s14   ;;  %s4449_s13 = sphi %s4533_s13, %s6032_s13  }
   0xd   : > { %p132_p0 = scmp.ne.s32.totalorder %s4453_s14, %s4449_s13  ;;  %p5900_p1 = scmp.eq.s32.totalorder %s4554_s17, 0 }
   0xe   : > { %p267_p3 = scmp.eq.s32.totalorder %s3456_s18, 3  ;;  %p3457_p5 = scmp.ge.s32.totalorder %s4461_s16, 1 }
   0xf   : > { %p4563_p4 = por %p5900_p1, %p132_p0  ;;  %p274_p7 = scmp.lt.s32.totalorder %s4461_s16, 5 }
  0x10   : > { %p4568_p6 = por %p267_p3, %p132_p0  ;;  %s4463_s22 = smov [#allocation5]  }
  0x11   : > { %s5926_s19 = scalar_select %p4563_p4, 1, 0 }
  0x12   : > { %s5927_s20 = scalar_select %p4568_p6, 1, 0 }
  0x13   : > { %p4573_p8 = pnand %p3457_p5, %p274_p7  ;;  %s298_s23 = sshll.u32 %s4463_s22, 4  ;;  %s299_s23 = int_to_ptr.vmem [resolvable:$true] %s298_s23 }
  0x14   : > { %s4464_s25 = smov [#allocation8]   ;;  %s4268_s27 = scalar_lea.vmem %s299_s23, 2048 }
  0x15   : > { %s5928_s21 = scalar_select %p4573_p8, 1, 0 }
  0x16   : > { %p4105_p9 = pneg %p4573_p8  ;;  %s324_s26 = sshll.u32 %s4464_s25, 4  ;;  %s325_s26 = int_to_ptr.vmem [resolvable:$true] %s324_s26 }
  0x17   : > { %p4269_p12 = scmp.ne.s32.totalorder %s299_s23, %s4268_s27  ;;  %p4276_p3 = scmp.lt.s32.totalorder %s299_s23, %s299_s23 }
  0x18   : > { %p4581_p10 = pnand %p4105_p9, %p5900_p1  ;;  %p4277_p5 = scmp.lt.s32.totalorder %s4268_s27, %s4268_s27 }
  0x1a   : > { %p4259_p11 = pneg %p4581_p10  ;;  %p4278_p7 = por %p4277_p5, %p4276_p3 }
  0x1c   : > { %p4271_p13 = pnand %p4269_p12, %p4259_p11 }
  0x1e   : > { %p4272_p0 = pneg %p4271_p13 }
  0x20   : > { %p4279_p2 = pnand %p4278_p7, %p4272_p0 }
  0x22   : > { %4282 = shalt.err (!%p4279_p2)
}
  0x23   : > { %s4465_s28 = smov 256   ;;  %s4466_s29 = smov 16  }
  0x24   : > { %s5930_s5 = sld [smem:[#allocation42_spill]]  ;;  %s4467_s12 = smov [#allocation7]  }
  0x25   : > { %s311_s18 = sshll.u32 %s4467_s12, 4  ;;  %s4294_s22 = scalar_lea.vmem %s325_s26, 1024  ;;  %s312_s18 = int_to_ptr.vmem [resolvable:$true] %s311_s18 }
  0x26   : > { %p4295_p9 = scmp.ne.s32.totalorder %s325_s26, %s4294_s22  ;;  %p4302_p0 = scmp.lt.s32.totalorder %s325_s26, %s325_s26 }
  0x27   : > { %p4303_p2 = scmp.lt.s32.totalorder %s4294_s22, %s4294_s22 }
  0x28   : > { %p4297_p12 = pnand %p4295_p9, %p4259_p11 }
  0x29   : > { %p4304_p3 = por %p4303_p2, %p4302_p0 }
  0x2a   : > { %4108 = dma.hbm_to_vmem [thread:$0]  (!%p4581_p10), %s5930_s5, 2048, %s299_s23, [#allocation6], %s4465_s28, %s4465_s28, %s4466_s29  }
  0x2b   : > { %p4298_p13 = pneg %p4297_p12 }
  0x2d   : > { %p4305_p5 = pnand %p4304_p3, %p4298_p13 }
  0x2f   : > { %4308 = shalt.err (!%p4305_p5)
}
  0x30   : > { %s5898_s25 = smov 128   ;;  %s5899_s27 = smov 8  }
  0x31   : > { %s5931_s7 = sld [smem:[#allocation44_spill]]  ;;  %s4320_s29 = scalar_lea.vmem %s312_s18, 1024 }
  0x32   : > { %p4321_p7 = scmp.ne.s32.totalorder %s312_s18, %s4320_s29  ;;  %p4328_p13 = scmp.lt.s32.totalorder %s312_s18, %s312_s18 }
  0x33   : > { %p4329_p0 = scmp.lt.s32.totalorder %s4320_s29, %s4320_s29 }
  0x34   : > { %p4323_p9 = pnand %p4321_p7, %p4259_p11 }
  0x35   : > { %p4330_p2 = por %p4329_p0, %p4328_p13 }
  0x36   : > { %p4324_p12 = pneg %p4323_p9 }
  0x37   : > { %4114 = dma.hbm_to_vmem [thread:$0]  (!%p4581_p10), %s5931_s7, 1024, %s325_s26, [#allocation9], %s5898_s25, %s5898_s25, %s5899_s27  }
  0x38   : > { %p4331_p3 = pnand %p4330_p2, %p4324_p12 }
  0x3a   : > { %4334 = shalt.err (!%p4331_p3)
}
  0x3b   : > { %s5932_s6 = sld [smem:[#allocation43_spill]]  ;;  %s4470_s26 = smov [#allocation10]  }
  0x3c   : > { %s337_s12 = sshll.u32 %s4470_s26, 4  ;;  %s338_s12 = int_to_ptr.vmem [resolvable:$true] %s337_s12 }
  0x3d   : > { %s4346_s22 = scalar_lea.vmem %s338_s12, 1024  ;;  %p4354_p12 = scmp.lt.s32.totalorder %s338_s12, %s338_s12 }
  0x3e   : > { %p4347_p5 = scmp.ne.s32.totalorder %s338_s12, %s4346_s22  ;;  %p4355_p13 = scmp.lt.s32.totalorder %s4346_s22, %s4346_s22 }
  0x40   : > { %p4349_p7 = pnand %p4347_p5, %p4259_p11  ;;  %p4356_p0 = por %p4355_p13, %p4354_p12 }
  0x41   : > { %4111 = dma.hbm_to_vmem [thread:$0]  (!%p4581_p10), %s5932_s6, 1024, %s312_s18, [#allocation6], %s5898_s25, %s5898_s25, %s5899_s27  }
  0x42   : > { %p4350_p9 = pneg %p4349_p7 }
  0x44   : > { %p4357_p2 = pnand %p4356_p0, %p4350_p9 }
  0x46   : > { %4360 = shalt.err (!%p4357_p2)
}
  0x47   : > { %s5933_s8 = sld [smem:[#allocation45_spill]]  ;;  %s4629_s28 = sadd.s32 1, %s4461_s16  }
  0x48   : > { %s119_s24 = sadd.s32 1, %s4457_s15  ;;  %s116_s29 = ssub.s32 %s4461_s16, %s4629_s28 }
  0x49   : > { %p126_p11 = scmp.ne.s32.totalorder %s4457_s15, %s4453_s14  ;;  %p117_p3 = scmp.eq.s32.totalorder %s116_s29, 0 }
  0x4a   : > { %p127_p5 = scmp.eq.s32.totalorder %s4461_s16, 0  ;;  %p5934_p7 = scmp.eq.s32.totalorder %s4554_s17, 3 }
  0x4b   : > { %p4130_p12 = scmp.lt.s32.totalorder %s4461_s16, 4  ;;  %s354_s26 = sand.u32 1, %s4457_s15  }
  0x4c   : > { %p4639_p9 = por %p5934_p7, %p126_p11  ;;  %p128_p13 = por %p127_p5, %p126_p11 }
  0x4d   : > { %4117 = dma.hbm_to_vmem [thread:$0]  (!%p4581_p10), %s5933_s8, 1024, %s338_s12, [#allocation9], %s5898_s25, %s5898_s25, %s5899_s27  }
  0x4e   : > { %s5935_s30 = scalar_select %p4639_p9, 1, 0 }
  0x4f   : > { %s4645_s11 = scalar_select %p117_p3, %s4457_s15, %s119_s24  }
  0x50   : > { %s3463_s22 = sshll.u32 %s354_s26, 8  ;;  %s3617_s12 = sshll.u32 %s4461_s16, 12 }
  0x51   : > { %s4652_s25 = scalar_lea.hbm %s5891_s4, %s3617_s12  ;;  %s358_s29 = scalar_lea.vmem [#allocation2], %s3463_s22 }
  0x52   : > { %s366_s27 = sshll.u32 %s358_s29, 4  ;;  %p4656_p10 = pnand %p4130_p12, %p128_p13  ;;  %s4654_s27 = int_to_ptr.vmem [resolvable:$true] %s366_s27 }
  0x53   : > { %s4660_s24 = scalar_lea.sflag [#allocation3], %s354_s26  ;;  %s4361_s6 = scalar_lea.hbm %s4652_s25, 4096 }
  0x54   : > { %p4362_p0 = scmp.ne.s32.totalorder %s4652_s25, %s4361_s6  ;;  %p4363_p2 = pneg %p4656_p10 }
  0x55   : > { %s4366_s22 = scalar_lea.hbm %s5891_s4, 16384  ;;  %p4367_p5 = scmp.lt.s32.totalorder %s4652_s25, %s5891_s4 }
  0x56   : > { %p4364_p11 = pnand %p4363_p2, %p4362_p0  ;;  %p4368_p7 = scmp.lt.s32.totalorder %s4366_s22, %s4361_s6 }
  0x58   : > { %p4365_p3 = pneg %p4364_p11  ;;  %p4369_p12 = por %p4368_p7, %p4367_p5 }
  0x5a   : > { %p4370_p13 = pnand %p4369_p12, %p4365_p3 }
  0x5c   : > { %4373 = shalt.err (!%p4370_p13)
}
  0x5d   : > { %s4374_s26 = scalar_lea.vmem %s4654_s27, 4096  ;;  %s4471_s7 = smov [#allocation2]  }
  0x5e   : > { %p4375_p1 = scmp.ne.s32.totalorder %s4654_s27, %s4374_s26  ;;  %s4379_s8 = sshll.u32 %s4471_s7, 4  ;;  %s4380_s8 = int_to_ptr.vmem [resolvable:$false] %s4379_s8 }
  0x5f   : > { %s4381_s12 = scalar_lea.vmem %s4380_s8, 8192  ;;  %p4382_p11 = scmp.lt.s32.totalorder %s4654_s27, %s4380_s8 }
  0x60   : > { %p4377_p6 = pnand %p4375_p1, %p4363_p2  ;;  %p4383_p9 = scmp.lt.s32.totalorder %s4381_s12, %s4374_s26 }
  0x62   : > { %p4378_p0 = pneg %p4377_p6  ;;  %p4384_p4 = por %p4383_p9, %p4382_p11 }
  0x64   : > { %p4385_p8 = pnand %p4384_p4, %p4378_p0 }
  0x66   : > { %4388 = shalt.err (!%p4385_p8)
}
  0x67   : > { %s5937_s6 = smov 8   ;;  %s5938_s18 = smov 128  }
  0x68   : > { %4121 = dma.hbm_to_vmem [thread:$0]  (!%p4656_p10), %s4652_s25, 4096, %s4654_s27, %s4660_s24, %s5938_s18, %s5938_s18, %s5937_s6  }
  0x69   : > { %p5939_p1 = scmp.ne.s32.totalorder %s5928_s21, 0 }
  0x6b   : > { %378 = sbr.rel (%p5939_p1) target bundleno = 1648 (0x670), region = 60 }
  0x70   : > { %s4687_s7 = sand.u32 1, %s4453_s14   ;;  %p5940_p4 = scmp.ne.s32.totalorder %s5926_s19, 0 }
  0x71   : > { %s3468_s8 = sshll.u32 %s4687_s7, 8  ;;  %s381_s22 = scalar_lea.sflag [#allocation3], %s4687_s7 }
  0x72   : > { %s4691_s23 = scalar_lea.vmem [#allocation2], %s3468_s8 }
  0x73   : > { %4432 = dma.done.wait (%p5940_p4), %s381_s22, 4096  }
  0x74   : > { %4434 = vsyncadd (%p5940_p4), %s381_s22, 4294963200  ;;  %p5941_p6 = scmp.eq.s32.totalorder %s4554_s17, 0 }
  0x76   : > { %4436 = dma.done.wait (%p5941_p6), [#allocation6], 3072   ;;  %p5942_p8 = pmov %p5941_p6 }
  0x77   : > { %p5943_p9 = pmov %p5941_p6 }
  0x78   : > { %4438 = vsyncadd (%p5942_p8), [#allocation6], 4294964224 }
  0x79   : > { %4440 = dma.done.wait (%p5943_p9), [#allocation9], 2048   ;;  %p5944_p10 = pmov %p5941_p6 }
  0x7a   : > { %vm470_vm0 = vcmask 523264   ;;  %v4706_v0 = vld [vmem:[%s4691_s23 + $0x40] sm:$0xff]  ;;  %v4712_v2 = vld [vmem:[%s4691_s23 + $0x48] sm:$0xff]  ;;  %v4726_v8 = vld [vmem:[%s4691_s23 + $0x50] sm:$0xff]  ;;  %vm832_vm1 = vcmask 130112   ;;  %vm839_vm2 = vcmask 195712  }
  0x7b   : > { %4442 = vsyncadd (%p5944_p10), [#allocation9], 4294965248  ;;  %v4709_v1 = vld [vmem:[%s4691_s23] sm:$0xff]  ;;  %v495_v3 = vsel %vm470_vm0, %v4706_v0, 0.0  ;;  %v4719_v5 = vld [vmem:[%s4691_s23 + $0x8] sm:$0xff]  ;;  %v498_v6 = vsel %vm470_vm0, %v4712_v2, 0.0 }
  0x7c   : > { %v471_v4 = vsel %vm470_vm0, %v4709_v1, 0.0  ;;  %496 = vadd.xlane.f32.xlu1 %v495_v3  ;;  %v474_v7 = vsel %vm470_vm0, %v4719_v5, 0.0  ;;  %v4729_v9 = vld [vmem:[%s4691_s23 + $0x10] sm:$0xff]  ;;  %v501_v10 = vsel %vm470_vm0, %v4726_v8, 0.0  ;;  %v4736_v12 = vld [vmem:[%s4691_s23 + $0x88] sm:$0xff]  ;;  %v4739_v13 = vld [vmem:[%s4691_s23 + $0x80] sm:$0xff] }
  0x7d   : > { %472 = vadd.xlane.f32.xlu0 %v471_v4  ;;  %v477_v11 = vsel %vm470_vm0, %v4729_v9, 0.0  ;;  %5945 = vst [vmem:[#allocation16_spill] sm:$0xff] %v4736_v12  ;;  %v522_v14 = vsel %vm470_vm0, %v4736_v12, 0.0  ;;  %v519_v15 = vsel %vm470_vm0, %v4739_v13, 0.0  ;;  %v4746_v16 = vld [vmem:[%s4691_s23 + $0x58] sm:$0xff]  ;;  %v4756_v20 = vld [vmem:[%s4691_s23 + $0xc0] sm:$0xff] }
  0x7e   : > { %v4749_v17 = vld [vmem:[%s4691_s23 + $0x18] sm:$0xff]  ;;  %v504_v18 = vsel %vm470_vm0, %v4746_v16, 0.0  ;;  %5946 = vst [vmem:[#allocation17_spill] sm:$0xff] %v4756_v20  ;;  %v4759_v21 = vld [vmem:[%s4691_s23 + $0x90] sm:$0xff]  ;;  %v543_v22 = vsel %vm470_vm0, %v4756_v20, 0.0  ;;  %v4766_v24 = vld [vmem:[%s4691_s23 + $0x20] sm:$0xff] }
  0x7f   : > { %v480_v19 = vsel %vm470_vm0, %v4749_v17, 0.0  ;;  %5947 = vst [vmem:[#allocation18_spill] sm:$0xff] %v4759_v21  ;;  %v525_v23 = vsel %vm470_vm0, %v4759_v21, 0.0  ;;  %v4769_v25 = vld [vmem:[%s4691_s23 + $0xc8] sm:$0xff]  ;;  %v483_v26 = vsel %vm470_vm0, %v4766_v24, 0.0  ;;  %v4776_v28 = vld [vmem:[%s4691_s23 + $0x98] sm:$0xff] }
  0x80   : > { %499 = vadd.xlane.f32.xlu1 %v498_v6  ;;  %5948 = vst [vmem:[#allocation19_spill] sm:$0xff] %v4769_v25  ;;  %v546_v27 = vsel %vm470_vm0, %v4769_v25, 0.0  ;;  %5949 = vst [vmem:[#allocation20_spill] sm:$0xff] %v4776_v28  ;;  %v4779_v29 = vld [vmem:[%s4691_s23 + $0x60] sm:$0xff]  ;;  %v528_v30 = vsel %vm470_vm0, %v4776_v28, 0.0  ;;  %v4786_v32 = vld [vmem:[%s4691_s23 + $0x28] sm:$0xff] }
  0x81   : > { %475 = vadd.xlane.f32.xlu0 %v474_v7  ;;  %v507_v31 = vsel %vm470_vm0, %v4779_v29, 0.0  ;;  %v4789_v33 = vld [vmem:[%s4691_s23 + $0xd0] sm:$0xff]  ;;  %v486_v34 = vsel %vm470_vm0, %v4786_v32, 0.0  ;;  %v4796_v36 = vld [vmem:[%s4691_s23 + $0xa0] sm:$0xff]  ;;  %v4799_v37 = vld [vmem:[%s4691_s23 + $0x68] sm:$0xff]  ;;  %v4472_v4 = vmov 0  }
  0x82   : > { %5950 = vst [vmem:[#allocation21_spill] sm:$0xff] %v4789_v33  ;;  %v549_v35 = vsel %vm470_vm0, %v4789_v33, 0.0  ;;  %5951 = vst [vmem:[#allocation22_spill] sm:$0xff] %v4796_v36  ;;  %v531_v38 = vsel %vm470_vm0, %v4796_v36, 0.0  ;;  %v510_v39 = vsel %vm470_vm0, %v4799_v37, 0.0  ;;  %v4806_v40 = vld [vmem:[%s4691_s23 + $0x30] sm:$0xff]  ;;  %4182 = vset.pattern.permute.xlu1 %v4472_v4  ;;  %4181 = vset.pattern.permute.xlu0 %v4472_v4 }
  0x83   : > { %v4809_v41 = vld [vmem:[%s4691_s23 + $0xd8] sm:$0xff]  ;;  %v489_v42 = vsel %vm470_vm0, %v4806_v40, 0.0  ;;  %v4816_v44 = vld [vmem:[%s4691_s23 + $0xa8] sm:$0xff]  ;;  %v4819_v45 = vld [vmem:[%s4691_s23 + $0x70] sm:$0xff]  ;;  %vm846_vm3 = vcmask 261312   ;;  %vm853_vm4 = vcmask 326912  }
  0x84   : > { %502 = vadd.xlane.f32.xlu1 %v501_v10  ;;  %5952 = vst [vmem:[#allocation23_spill] sm:$0xff] %v4809_v41  ;;  %v552_v43 = vsel %vm470_vm0, %v4809_v41, 0.0  ;;  %5953 = vst [vmem:[#allocation24_spill] sm:$0xff] %v4816_v44  ;;  %v534_v46 = vsel %vm470_vm0, %v4816_v44, 0.0  ;;  %v513_v47 = vsel %vm470_vm0, %v4819_v45, 0.0  ;;  %v4826_v48 = vld [vmem:[%s4691_s23 + $0x38] sm:$0xff] }
  0x85   : > { %478 = vadd.xlane.f32.xlu0 %v477_v11  ;;  %5954 = vst [vmem:[#allocation25_spill] sm:$0xff] %v4826_v48  ;;  %v4829_v49 = vld [vmem:[%s4691_s23 + $0xe0] sm:$0xff]  ;;  %v492_v50 = vsel %vm470_vm0, %v4826_v48, 0.0  ;;  %v4836_v52 = vld [vmem:[%s4691_s23 + $0xb0] sm:$0xff]  ;;  %v4839_v53 = vld [vmem:[%s4691_s23 + $0x78] sm:$0xff]  ;;  %vm860_vm5 = vcmask 392512  }
  0x86   : > { %5955 = vst [vmem:[#allocation26_spill] sm:$0xff] %v4829_v49  ;;  %v555_v51 = vsel %vm470_vm0, %v4829_v49, 0.0  ;;  %5956 = vst [vmem:[#allocation27_spill] sm:$0xff] %v4836_v52  ;;  %v537_v54 = vsel %vm470_vm0, %v4836_v52, 0.0  ;;  %v516_v55 = vsel %vm470_vm0, %v4839_v53, 0.0  ;;  %v4846_v56 = vld [vmem:[%s4691_s23 + $0xb8] sm:$0xff] }
  0x87   : > { %5957 = vst [vmem:[#allocation28_spill] sm:$0xff] %v4846_v56  ;;  %v4849_v57 = vld [vmem:[%s4691_s23 + $0xe8] sm:$0xff]  ;;  %v540_v58 = vsel %vm470_vm0, %v4846_v56, 0.0  ;;  %v4856_v60 = vld [vmem:[%s4691_s23 + $0xf8] sm:$0xff]  ;;  %v4859_v61 = vld [vmem:[%s4691_s23 + $0xf0] sm:$0xff]  ;;  %vm867_vm6 = vcmask 458112  }
  0x88   : > { %523 = vadd.xlane.f32.xlu1 %v522_v14  ;;  %5958 = vst [vmem:[#allocation29_spill] sm:$0xff] %v4849_v57  ;;  %v558_v59 = vsel %vm470_vm0, %v4849_v57, 0.0  ;;  %5959 = vst [vmem:[#allocation30_spill] sm:$0xff] %v4856_v60  ;;  %v564_v62 = vsel %vm470_vm0, %v4856_v60, 0.0  ;;  %v561_v63 = vsel %vm470_vm0, %v4859_v61, 0.0  ;;  %vm874_vm7 = vcmask 523712  }
  0x89   : > { %520 = vadd.xlane.f32.xlu0 %v519_v15  ;;  %5960 = vst [vmem:[#allocation31_spill] sm:$0xff] %v4859_v61  ;;  %v3474_v3 = vld [vmem:[%s5888_s1] ss:$0 sm:$0xff]  ;;  %vm993_vm8 = vcmask 1041409   ;;  %vm995_vm9 = vcmask 1042434   ;;  %vm997_vm10 = vcmask 1043459  }
  0x8a   : > { %vm4474_vm11 = vmmov 0   ;;  %s4475_s29 = smov 64   ;;  %vm2711_vm12 = vcmask 1043456   ;;  %vm2288_vm13 = vcmask 31744   ;;  %s3473_s6 = sshll.u32 %s4687_s7, 2  ;;  %vm3332_vm14 = vcmask 519168  }
  0x8b   : > { %s3613_s22 = sshll.u32 %s4554_s17, 6  ;;  %s436_s23 = scalar_lea.vmem [#allocation11], %s3473_s6 }
  0x8c   : > { %505 = vadd.xlane.f32.xlu1 %v504_v18  ;;  %s3348_s5 = sshll.u32 %s436_s23, 4  ;;  %s5851_s25 = scalar_lea.hbm %s5897_s10, %s3613_s22  ;;  %s3349_s5 = int_to_ptr.vmem [resolvable:$true] %s3348_s5 }
  0x8d   : > { %481 = vadd.xlane.f32.xlu0 %v480_v19  ;;  %s3335_s27 = scalar_lea.sflag [#allocation4], %s4687_s7  ;;  %s4389_s24 = scalar_lea.vmem %s3349_s5, 64 }
  0x8e   : > { %p4390_p2 = scmp.ne.s32.totalorder %s3349_s5, %s4389_s24  ;;  %p6030_p3 = scmp.ne.s32.totalorder %s5935_s30, 0 }
  0x8f   : > { %s4477_s17 = smov [#allocation11]  }
  0x90   : > { %544 = vadd.xlane.f32.xlu1 %v543_v22  ;;  %p4391_p5 = pnand %p4390_p2, %p6030_p3 }
  0x91   : > { %526 = vadd.xlane.f32.xlu0 %v525_v23 }
  0x92   : > { %p4392_p7 = pneg %p4391_p5 }
  0x94   : > { %484 = vadd.xlane.f32.xlu1 %v483_v26 }
  0x95   : > { %547 = vadd.xlane.f32.xlu0 %v546_v27 }
  0x98   : > { %529 = vadd.xlane.f32.xlu1 %v528_v30 }
  0x99   : > { %508 = vadd.xlane.f32.xlu0 %v507_v31 }
  0x9c   : > { %487 = vadd.xlane.f32.xlu1 %v486_v34 }
  0x9d   : > { %550 = vadd.xlane.f32.xlu0 %v549_v35 }
  0xa0   : > { %532 = vadd.xlane.f32.xlu1 %v531_v38 }
  0xa1   : > { %511 = vadd.xlane.f32.xlu0 %v510_v39 }
  0xa4   : > { %490 = vadd.xlane.f32.xlu1 %v489_v42 }
  0xa5   : > { %553 = vadd.xlane.f32.xlu0 %v552_v43 }
  0xa8   : > { %535 = vadd.xlane.f32.xlu1 %v534_v46 }
  0xa9   : > { %514 = vadd.xlane.f32.xlu0 %v513_v47 }
  0xac   : > { %493 = vadd.xlane.f32.xlu1 %v492_v50 }
  0xad   : > { %556 = vadd.xlane.f32.xlu0 %v555_v51 }
  0xb0   : > { %538 = vadd.xlane.f32.xlu1 %v537_v54 }
  0xb1   : > { %517 = vadd.xlane.f32.xlu0 %v516_v55 }
  0xb4   : > { %541 = vadd.xlane.f32.xlu1 %v540_v58 }
  0xb5   : > { %559 = vadd.xlane.f32.xlu0 %v558_v59 }
  0xb8   : > { %565 = vadd.xlane.f32.xlu1 %v564_v62 }
  0xb9   : > { %562 = vadd.xlane.f32.xlu0 %v561_v63 }
  0xc9   : > { %611 = vbcast.lane.b32.xlu1 %v3474_v3, 264 }
  0xcd   : > { %615 = vbcast.lane.b32.xlu1 %v3474_v3, 272 }
  0xcf   : > { %607 = vbcast.lane.b32.xlu0 %v3474_v3, 256 }
  0xd1   : > { %619 = vbcast.lane.b32.xlu1 %v3474_v3, 280 }
  0xd3   : > { %623 = vbcast.lane.b32.xlu0 %v3474_v3, 288 }
  0xd5   : > { %627 = vbcast.lane.b32.xlu1 %v3474_v3, 296 }
  0xd7   : > { %631 = vbcast.lane.b32.xlu0 %v3474_v3, 304 }
  0xd9   : > { %635 = vbcast.lane.b32.xlu1 %v3474_v3, 312 }
 0x105   : > { %v497_v6 = vpop.xlane.xlu1 %496 }
 0x106   : > { %v473_v7 = vpop.xlane.xlu0 %472  ;;  %v576_v41 = vmul.f32 0.015625, %v497_v6 }
 0x107   : > { %v568_v60 = vmul.f32 0.015625, %v473_v7 }
 0x109   : > { %v500_v10 = vpop.xlane.xlu1 %499 }
 0x10a   : > { %v476_v11 = vpop.xlane.xlu0 %475  ;;  %v577_v44 = vmul.f32 0.015625, %v500_v10 }
 0x10b   : > { %v569_v61 = vmul.f32 0.015625, %v476_v11 }
 0x10d   : > { %v503_v14 = vpop.xlane.xlu1 %502 }
 0x10e   : > { %v479_v15 = vpop.xlane.xlu0 %478  ;;  %v578_v28 = vmul.f32 0.015625, %v503_v14 }
 0x10f   : > { %v570_v20 = vmul.f32 0.015625, %v479_v15 }
 0x111   : > { %v524_v18 = vpop.xlane.xlu1 %523 }
 0x112   : > { %v521_v19 = vpop.xlane.xlu0 %520  ;;  %v585_v12 = vmul.f32 0.015625, %v524_v18 }
 0x113   : > { %v584_v7 = vmul.f32 0.015625, %v521_v19 }
 0x115   : > { %v506_v22 = vpop.xlane.xlu1 %505 }
 0x116   : > { %v482_v23 = vpop.xlane.xlu0 %481  ;;  %v579_v6 = vmul.f32 0.015625, %v506_v22 }
 0x117   : > { %v571_v10 = vmul.f32 0.015625, %v482_v23 }
 0x119   : > { %v545_v26 = vpop.xlane.xlu1 %544 }
 0x11a   : > { %v527_v27 = vpop.xlane.xlu0 %526 }
 0x11d   : > { %v485_v30 = vpop.xlane.xlu1 %484 }
 0x11e   : > { %v548_v31 = vpop.xlane.xlu0 %547 }
 0x11f   : > { %v593_v14 = vmul.f32 0.015625, %v548_v31 }
 0x121   : > { %v4868_v34 = vpop.xlane.xlu1 %529 }
 0x122   : > { %v509_v35 = vpop.xlane.xlu0 %508 }
 0x123   : > { %v580_v15 = vmul.f32 0.015625, %v509_v35 }
 0x125   : > { %v4870_v38 = vpop.xlane.xlu1 %487 }
 0x126   : > { %v4872_v39 = vpop.xlane.xlu0 %550  ;;  %v573_v23 = vmul.f32 0.015625, %v4870_v38 }
 0x129   : > { %v4874_v42 = vpop.xlane.xlu1 %532 }
 0x12a   : > { %v4876_v43 = vpop.xlane.xlu0 %511 }
 0x12d   : > { %v4878_v46 = vpop.xlane.xlu1 %490 }
 0x12e   : > { %v4880_v47 = vpop.xlane.xlu0 %553 }
 0x131   : > { %v4882_v50 = vpop.xlane.xlu1 %535 }
 0x132   : > { %v4884_v51 = vpop.xlane.xlu0 %514 }
 0x135   : > { %v4886_v54 = vpop.xlane.xlu1 %493 }
 0x136   : > { %v4888_v55 = vpop.xlane.xlu0 %556 }
 0x139   : > { %v4890_v58 = vpop.xlane.xlu1 %538 }
 0x13a   : > { %v4892_v59 = vpop.xlane.xlu0 %517 }
 0x13d   : > { %v4894_v62 = vpop.xlane.xlu1 %541 }
 0x13e   : > { %v4896_v63 = vpop.xlane.xlu0 %559 }
 0x141   : > { %v4898_v3 = vpop.xlane.xlu1 %565 }
 0x142   : > { %v4900_v4 = vpop.xlane.xlu0 %562 }
 0x145   : > { %v612_v57 = vpop.permute.xlu1 %611 }
 0x146   : > { %v608_v56 = vpop.permute.xlu0 %607  ;;  %v646_v49 = vadd.f32 %v612_v57, %v569_v61  ;;  %v654_v36 = vadd.f32 %v612_v57, %v577_v44  ;;  %v662_v61 = vadd.f32 %v612_v57, %v585_v12 }
 0x147   : > { %v645_v52 = vadd.f32 %v608_v56, %v568_v60  ;;  %v653_v33 = vadd.f32 %v608_v56, %v576_v41  ;;  %v661_v11 = vadd.f32 %v608_v56, %v584_v7  ;;  %v574_v7 = vmul.f32 0.015625, %v4878_v46  ;;  %v692_v46 = vld [vmem:[#allocation5 + $0x78] sm:$0xff] }
 0x148   : > { %729 = vperm.xlu1 %4182, %v646_v49   ;;  %v592_v49 = vmul.f32 0.015625, %v545_v26  ;;  %v594_v26 = vmul.f32 0.015625, %v4872_v39  ;;  %1017 = vmatprep.subr.mxu0 %v692_v46  ;;  %v5972_v46 = vld [vmem:[#allocation26_spill] sm:$0xff] }
 0x149   : > { %726 = vperm.xlu0 %4181, %v645_v52   ;;  %v616_v25 = vpop.permute.xlu1 %615  ;;  %v586_v52 = vmul.f32 0.015625, %v527_v27 }
 0x14a   : > { %v647_v21 = vadd.f32 %v616_v25, %v570_v20  ;;  %v655_v48 = vadd.f32 %v616_v25, %v578_v28  ;;  %v669_v20 = vadd.f32 %v608_v56, %v592_v49  ;;  %v624_v28 = vpop.permute.xlu0 %623  ;;  %v671_v56 = vadd.f32 %v616_v25, %v594_v26  ;;  %v690_v49 = vld [vmem:[#allocation5 + $0x68] sm:$0xff]  ;;  %v680_v26 = vld [vmem:[#allocation5 + $0x18] sm:$0xff] }
 0x14b   : > { %v657_v18 = vadd.f32 %v624_v28, %v580_v15  ;;  %v599_v15 = vmul.f32 0.015625, %v4898_v3  ;;  %v1247_v3 = vld [vmem:[#allocation7 + $0x38] sm:$0xff] }
 0x14c   : > { %750 = vperm.xlu1 %4182, %v653_v33   ;;  %v663_v33 = vadd.f32 %v616_v25, %v586_v52  ;;  %v589_v25 = vmul.f32 0.015625, %v4882_v50  ;;  %v590_v50 = vmul.f32 0.015625, %v4890_v58  ;;  %v689_v52 = vld [vmem:[#allocation5 + $0x60] sm:$0xff]  ;;  %3793 = vmatprep.subr.mxu1 %v1247_v3 }
 0x14d   : > { %753 = vperm.xlu0 %4181, %v654_v36   ;;  %v620_v60 = vpop.permute.xlu1 %619  ;;  %v572_v36 = vmul.f32 0.015625, %v485_v30  ;;  %v588_v30 = vmul.f32 0.015625, %v4874_v42  ;;  %v685_v58 = vld [vmem:[#allocation5 + $0x40] sm:$0xff]  ;;  %3794 = vmatpush3.msra.mxu1 %v1247_v3 }
 0x14e   : > { %v648_v41 = vadd.f32 %v620_v60, %v571_v10  ;;  %v656_v44 = vadd.f32 %v620_v60, %v579_v6  ;;  %v632_v35 = vpop.permute.xlu0 %631  ;;  %v575_v10 = vmul.f32 0.015625, %v4886_v54  ;;  %v688_v54 = vld [vmem:[#allocation5 + $0x58] sm:$0xff] }
 0x14f   : > { %v649_v12 = vadd.f32 %v624_v28, %v572_v36  ;;  %v651_v39 = vadd.f32 %v632_v35, %v574_v7  ;;  %v591_v36 = vmul.f32 0.015625, %v4894_v62  ;;  %v1241_v7 = vld [vmem:[#allocation7 + $0x8] sm:$0xff] }
 0x150   : > { %732 = vperm.xlu1 %4182, %v647_v21   ;;  %v670_v21 = vadd.f32 %v612_v57, %v593_v14  ;;  %v581_v57 = vmul.f32 0.015625, %v4876_v43  ;;  %v597_v14 = vmul.f32 0.015625, %v4896_v63 }
 0x151   : > { %756 = vperm.xlu0 %4181, %v655_v48   ;;  %v587_v48 = vmul.f32 0.015625, %v4868_v34  ;;  %v628_v22 = vpop.permute.xlu1 %627  ;;  %v665_v34 = vadd.f32 %v624_v28, %v588_v30  ;;  %v677_v30 = vld [vmem:[#allocation5] sm:$0xff] }
 0x152   : > { %v650_v27 = vadd.f32 %v628_v22, %v573_v23  ;;  %v658_v31 = vadd.f32 %v628_v22, %v581_v57  ;;  %v666_v43 = vadd.f32 %v628_v22, %v589_v25  ;;  %v681_v23 = vld [vmem:[#allocation5 + $0x20] sm:$0xff]  ;;  %v1245_v57 = vld [vmem:[#allocation7 + $0x28] sm:$0xff] }
 0x153   : > { %v664_v19 = vadd.f32 %v620_v60, %v587_v48  ;;  %v683_v48 = vld [vmem:[#allocation5 + $0x30] sm:$0xff]  ;;  %v5969_v25 = vld [vmem:[#allocation24_spill] sm:$0xff] }
 0x154   : > { %774 = vperm.xlu1 %4182, %v661_v11   ;;  %v595_v11 = vmul.f32 0.015625, %v4880_v47 }
 0x155   : > { %777 = vperm.xlu0 %4181, %v662_v61   ;;  %v582_v61 = vmul.f32 0.015625, %v4884_v51  ;;  %v636_v6 = vpop.permute.xlu1 %635  ;;  %v583_v51 = vmul.f32 0.015625, %v4892_v59  ;;  %v674_v59 = vadd.f32 %v628_v22, %v597_v14  ;;  %v679_v22 = vld [vmem:[#allocation5 + $0x10] sm:$0xff]  ;;  %v5976_v14 = vld [vmem:[#allocation30_spill] sm:$0xff] }
 0x156   : > { %v672_v38 = vadd.f32 %v620_v60, %v595_v11  ;;  %v691_v60 = vld [vmem:[#allocation5 + $0x70] sm:$0xff]  ;;  %v676_v63 = vadd.f32 %v636_v6, %v599_v15  ;;  %v1240_v11 = vld [vmem:[#allocation7] sm:$0xff] }
 0x157   : > { %v659_v42 = vadd.f32 %v632_v35, %v582_v61  ;;  %1018 = vmatpush1.msra.mxu0 %v691_v60 }
 0x158   : > { %735 = vperm.xlu1 %4182, %v648_v41   ;;  %v596_v41 = vmul.f32 0.015625, %v4888_v55  ;;  %1019 = vmatprep.subr.mxu0 %v690_v49  ;;  %v667_v55 = vadd.f32 %v632_v35, %v590_v50  ;;  %v821_v49 = vlaneseq  ;;  %v5974_v50 = vld [vmem:[#allocation29_spill] sm:$0xff] }
 0x159   : > { %759 = vperm.xlu0 %4181, %v656_v44   ;;  %v652_v44 = vadd.f32 %v636_v6, %v575_v10  ;;  %1020 = vmatpush1.msra.mxu0 %v689_v52 }
 0x15a   : > { %v673_v47 = vadd.f32 %v624_v28, %v596_v41  ;;  %1021 = vmatprep.subr.mxu0 %v688_v54  ;;  %v686_v28 = vld [vmem:[#allocation5 + $0x48] sm:$0xff]  ;;  %v822_v54 = vand.u32 127, %v821_v49 }
 0x15c   : > { %780 = vperm.xlu1 %4182, %v663_v33   ;;  %v660_v33 = vadd.f32 %v636_v6, %v583_v51 }
 0x15d   : > { %798 = vperm.xlu0 %4181, %v669_v20   ;;  %v687_v20 = vld [vmem:[#allocation5 + $0x50] sm:$0xff] }
 0x15e   : > { %1022 = vmatpush1.msra.mxu0 %v687_v20 }
 0x15f   : > { %1023 = vmatprep.subr.mxu0 %v686_v28  ;;  %v4991_v28 = vshrl.u32 %v821_v49, 7 }
 0x160   : > { %801 = vperm.xlu1 %4182, %v670_v21   ;;  %v668_v21 = vadd.f32 %v636_v6, %v591_v36  ;;  %1024 = vmatpush1.msra.mxu0 %v685_v58  ;;  %v5971_v6 = vld [vmem:[#allocation27_spill] sm:$0xff]  ;;  %v827_v36 = vadd.s32 4294967288, %v822_v54  ;;  %v834_v58 = vadd.s32 4294967280, %v822_v54 }
 0x161   : > { %738 = vperm.xlu0 %4181, %v649_v12   ;;  %v684_v12 = vld [vmem:[#allocation5 + $0x38] sm:$0xff] }
 0x162   : > { %1025 = vmatprep.subr.mxu0 %v684_v12  ;;  %v830_v15 = vsub.s32 %v827_v36, %v4991_v28 }
 0x163   : > { %1026 = vmatpush1.msra.mxu0 %v683_v48  ;;  %v848_v48 = vadd.s32 4294967264, %v822_v54 }
 0x164   : > { %762 = vperm.xlu1 %4182, %v657_v18   ;;  %v598_v18 = vmul.f32 0.015625, %v4900_v4  ;;  %v1246_v4 = vld [vmem:[#allocation7 + $0x30] sm:$0xff] }
 0x165   : > { %783 = vperm.xlu0 %4181, %v664_v19   ;;  %v682_v19 = vld [vmem:[#allocation5 + $0x28] sm:$0xff]  ;;  %3795 = vmatprep.subr.mxu1 %v1246_v4 }
 0x166   : > { %v675_v62 = vadd.f32 %v632_v35, %v598_v18  ;;  %1027 = vmatprep.subr.mxu0 %v682_v19  ;;  %3796 = vmatpush3.msra.mxu1 %v1246_v4  ;;  %v1242_v35 = vld [vmem:[#allocation7 + $0x10] sm:$0xff]  ;;  %v825_v18 = vsub.s32 %v822_v54, %v4991_v28  ;;  %v855_v19 = vadd.s32 4294967256, %v822_v54 }
 0x167   : > { %1028 = vmatpush1.msra.mxu0 %v681_v23  ;;  %3797 = vmatprep.subr.mxu1 %v1245_v57 }
 0x168   : > { %804 = vperm.xlu1 %4182, %v671_v56   ;;  %v678_v56 = vld [vmem:[#allocation5 + $0x8] sm:$0xff]  ;;  %1029 = vmatprep.subr.mxu0 %v680_v26 }
 0x169   : > { %741 = vperm.xlu0 %4181, %v650_v27   ;;  %v5920_v27 = vmov 0.0   ;;  %1030 = vmatpush1.msra.mxu0 %v679_v22  ;;  %v5011_v22 = vsub.s32 %v848_v48, %v4991_v28 }
 0x16a   : > { %1065 = vmatprep.mubr.f32.mxu0 %v5920_v27  ;;  %1031 = vmatprep.subr.mxu0 %v678_v56  ;;  %v862_v56 = vadd.s32 4294967248, %v822_v54 }
 0x16b   : > { %1032 = vmatpush1.msra.mxu0 %v677_v30  ;;  %3798 = vmatpush3.msra.mxu1 %v1245_v57  ;;  %v5016_v30 = vsub.s32 %v855_v19, %v4991_v28 }
 0x16c   : > { %765 = vperm.xlu1 %4182, %v658_v31   ;;  %v1244_v31 = vld [vmem:[#allocation7 + $0x20] sm:$0xff] }
 0x16d   : > { %786 = vperm.xlu0 %4181, %v665_v34   ;;  %v1243_v34 = vld [vmem:[#allocation7 + $0x18] sm:$0xff]  ;;  %3799 = vmatprep.subr.mxu1 %v1244_v31 }
 0x16e   : > { %3800 = vmatpush3.msra.mxu1 %v1244_v31 }
 0x16f   : > { %3801 = vmatprep.subr.mxu1 %v1243_v34 }
 0x170   : > { %807 = vperm.xlu1 %4182, %v672_v38   ;;  %3802 = vmatpush3.msra.mxu1 %v1243_v34 }
 0x171   : > { %744 = vperm.xlu0 %4181, %v651_v39   ;;  %3803 = vmatprep.subr.mxu1 %v1242_v35  ;;  %v5968_v39 = vld [vmem:[#allocation21_spill] sm:$0xff] }
 0x172   : > { %3804 = vmatpush3.msra.mxu1 %v1242_v35  ;;  %v869_v35 = vadd.s32 4294967240, %v822_v54 }
 0x173   : > { %3805 = vmatprep.subr.mxu1 %v1241_v7 }
 0x174   : > { %768 = vperm.xlu1 %4182, %v659_v42   ;;  %3806 = vmatpush3.msra.mxu1 %v1241_v7 }
 0x175   : > { %789 = vperm.xlu0 %4181, %v666_v43   ;;  %3807 = vmatprep.subr.mxu1 %v1240_v11  ;;  %v5970_v43 = vld [vmem:[#allocation23_spill] sm:$0xff] }
 0x176   : > { %3808 = vmatpush3.msra.mxu1 %v1240_v11 }
 0x178   : > { %810 = vperm.xlu1 %4182, %v673_v47   ;;  %v5973_v47 = vld [vmem:[#allocation28_spill] sm:$0xff] }
 0x179   : > { %747 = vperm.xlu0 %4181, %v652_v44  }
 0x17c   : > { %771 = vperm.xlu1 %4182, %v660_v33   ;;  %v5975_v33 = vld [vmem:[#allocation31_spill] sm:$0xff] }
 0x17d   : > { %792 = vperm.xlu0 %4181, %v667_v55  }
 0x180   : > { %813 = vperm.xlu1 %4182, %v674_v59   ;;  %v841_v59 = vadd.s32 4294967272, %v822_v54 }
 0x181   : > { %795 = vperm.xlu0 %4181, %v668_v21  }
 0x184   : > { %816 = vperm.xlu1 %4182, %v675_v62   ;;  %v5001_v62 = vsub.s32 %v834_v58, %v4991_v28 }
 0x185   : > { %819 = vperm.xlu0 %4181, %v676_v63   ;;  %v5004_v63 = vsub.s32 %v841_v59, %v4991_v28 }
 0x1a3   : > { %1104 = vxpose.xlu0.b32.start [1/8] (short) (narrow) %v4706_v0, 64 }
 0x1a7   : > { %1105 = vxpose.xlu0.b32.cont [2/8] (short) (narrow) %v4712_v2, 64  ;;  %v5961_v2 = vld [vmem:[#allocation16_spill] sm:$0xff] }
 0x1ab   : > { %1106 = vxpose.xlu0.b32.cont [3/8] (short) (narrow) %v4726_v8, 64 }
 0x1ad   : > { %1072 = vxpose.xlu1.b32.start [1/8] (short) (narrow) %v4709_v1, 64 }
 0x1af   : > { %1107 = vxpose.xlu0.b32.cont [4/8] (short) (narrow) %v4746_v16, 64  ;;  %v5963_v16 = vld [vmem:[#allocation18_spill] sm:$0xff] }
 0x1b1   : > { %1073 = vxpose.xlu1.b32.cont [2/8] (short) (narrow) %v4719_v5, 64 }
 0x1b3   : > { %1108 = vxpose.xlu0.b32.cont [5/8] (short) (narrow) %v4779_v29, 64  ;;  %v5965_v29 = vld [vmem:[#allocation20_spill] sm:$0xff] }
 0x1b5   : > { %1074 = vxpose.xlu1.b32.cont [3/8] (short) (narrow) %v4729_v9, 64  ;;  %v5962_v9 = vld [vmem:[#allocation25_spill] sm:$0xff] }
 0x1b7   : > { %1109 = vxpose.xlu0.b32.cont [6/8] (short) (narrow) %v4799_v37, 64 }
 0x1b9   : > { %1075 = vxpose.xlu1.b32.cont [4/8] (short) (narrow) %v4749_v17, 64 }
 0x1bb   : > { %1110 = vxpose.xlu0.b32.cont [7/8] (short) (narrow) %v4819_v45, 64  ;;  %v5967_v45 = vld [vmem:[#allocation22_spill] sm:$0xff] }
 0x1bd   : > { %1076 = vxpose.xlu1.b32.cont [5/8] (short) (narrow) %v4766_v24, 64 }
 0x1bf   : > { %1111 = vxpose.xlu0.b32.end [8/8] (short) (narrow) %v4839_v53, 64 }
 0x1c1   : > { %1077 = vxpose.xlu1.b32.cont [6/8] (short) (narrow) %v4786_v32, 64 }
 0x1c3   : > { %1136 = vxpose.xlu0.b32.start [1/8] (short) (narrow) %v4739_v13, 64  ;;  %v4935_v0 = vpop.permute.xlu1 %729  ;;  %v5964_v13 = vld [vmem:[#allocation17_spill] sm:$0xff] }
 0x1c4   : > { %v4937_v1 = vpop.permute.xlu0 %726  ;;  %v831_v3 = vrot.slane %v4935_v0, %v830_v15 }
 0x1c5   : > { %1078 = vxpose.xlu1.b32.cont [7/8] (short) (narrow) %v4806_v40, 64  ;;  %v5966_v40 = vld [vmem:[#allocation19_spill] sm:$0xff]  ;;  %v826_v4 = vrot.slane %v4937_v1, %v825_v18 }
 0x1c7   : > { %1137 = vxpose.xlu0.b32.cont [2/8] (short) (narrow) %v5961_v2, 64  ;;  %v4941_v5 = vpop.permute.xlu1 %750 }
 0x1c8   : > { %v4943_v8 = vpop.permute.xlu0 %753  ;;  %v879_v57 = vrot.slane %v4941_v5, %v825_v18 }
 0x1c9   : > { %1079 = vxpose.xlu1.b32.end [8/8] (short) (narrow) %v5962_v9, 64  ;;  %v883_v31 = vrot.slane %v4943_v8, %v830_v15 }
 0x1cb   : > { %1138 = vxpose.xlu0.b32.cont [3/8] (short) (narrow) %v5963_v16, 64  ;;  %v4947_v17 = vpop.permute.xlu1 %732  ;;  %v5035_v16 = vsub.s32 %v862_v56, %v4991_v28 }
 0x1cc   : > { %v4949_v24 = vpop.permute.xlu0 %756  ;;  %v838_v34 = vrot.slane %v4947_v17, %v5001_v62  ;;  %v833_v17 = vsel %vm832_vm1, %v831_v3, %v826_v4 }
 0x1cd   : > { %1168 = vxpose.xlu1.b32.start [1/8] (short) (narrow) %v5964_v13, 64  ;;  %v888_v7 = vrot.slane %v4949_v24, %v5001_v62 }
 0x1cf   : > { %1139 = vxpose.xlu0.b32.cont [4/8] (short) (narrow) %v5965_v29, 64  ;;  %v4953_v32 = vpop.permute.xlu1 %774  ;;  %v884_v29 = vsel %vm832_vm1, %v883_v31, %v879_v57 }
 0x1d0   : > { %v4955_v37 = vpop.permute.xlu0 %777  ;;  %v918_v11 = vrot.slane %v4953_v32, %v825_v18  ;;  %v840_v32 = vsel %vm839_vm2, %v838_v34, %v833_v17  ;;  %v1573_v17 = vld [vmem:[#allocation8 + $0x20] sm:$0xff] }
 0x1d1   : > { %1169 = vxpose.xlu1.b32.cont [2/8] (short) (narrow) %v5966_v40, 64  ;;  %v922_v0 = vrot.slane %v4955_v37, %v830_v15  ;;  %v872_v37 = vsub.s32 %v869_v35, %v4991_v28  ;;  %v889_v40 = vsel %vm839_vm2, %v888_v7, %v884_v29  ;;  %v1570_v29 = vld [vmem:[#allocation8 + $0x8] sm:$0xff] }
 0x1d3   : > { %1140 = vxpose.xlu0.b32.cont [5/8] (short) (narrow) %v5967_v45, 64  ;;  %v4959_v53 = vpop.permute.xlu1 %735  ;;  %v923_v45 = vsel %vm832_vm1, %v922_v0, %v918_v11 }
 0x1d4   : > { %v4961_v38 = vpop.permute.xlu0 %759  ;;  %v845_v1 = vrot.slane %v4959_v53, %v5004_v63 }
 0x1d5   : > { %1170 = vxpose.xlu1.b32.cont [3/8] (short) (narrow) %v5968_v39, 64  ;;  %v893_v5 = vrot.slane %v4961_v38, %v5004_v63 }
 0x1d6   : > { %v847_v53 = vsel %vm846_vm3, %v845_v1, %v840_v32  ;;  %v1569_v32 = vld [vmem:[#allocation8] sm:$0xff] }
 0x1d7   : > { %1141 = vxpose.xlu0.b32.cont [6/8] (short) (narrow) %v5969_v25, 64  ;;  %v4965_v61 = vpop.permute.xlu1 %780 }
 0x1d8   : > { %v4967_v42 = vpop.permute.xlu0 %798  ;;  %v927_v8 = vrot.slane %v4965_v61, %v5001_v62  ;;  %v894_v61 = vsel %vm846_vm3, %v893_v5, %v889_v40 }
 0x1d9   : > { %1171 = vxpose.xlu1.b32.cont [4/8] (short) (narrow) %v5970_v43, 64  ;;  %v957_v38 = vrot.slane %v4967_v42, %v825_v18 }
 0x1da   : > { %v928_v43 = vsel %vm839_vm2, %v927_v8, %v923_v45  ;;  %v1575_v8 = vld [vmem:[#allocation8 + $0x30] sm:$0xff] }
 0x1db   : > { %1142 = vxpose.xlu0.b32.cont [7/8] (short) (narrow) %v5971_v6, 64  ;;  %v4971_v10 = vpop.permute.xlu1 %801 }
 0x1dc   : > { %v4973_v41 = vpop.permute.xlu0 %738  ;;  %v961_v24 = vrot.slane %v4971_v10, %v830_v15 }
 0x1dd   : > { %1172 = vxpose.xlu1.b32.cont [5/8] (short) (narrow) %v5972_v46, 64  ;;  %v852_v13 = vrot.slane %v4973_v41, %v5011_v22  ;;  %v1576_v41 = vld [vmem:[#allocation8 + $0x38] sm:$0xff] }
 0x1de   : > { %v962_v46 = vsel %vm832_vm1, %v961_v24, %v957_v38  ;;  %3857 = vmatprep.subr.mxu0 %v1576_v41  ;;  %v1572_v24 = vld [vmem:[#allocation8 + $0x18] sm:$0xff] }
 0x1df   : > { %1143 = vxpose.xlu0.b32.end [8/8] (short) (narrow) %v5973_v47, 64  ;;  %v4977_v44 = vpop.permute.xlu1 %762  ;;  %v854_v47 = vsel %vm853_vm4, %v852_v13, %v847_v53  ;;  %v1571_v13 = vld [vmem:[#allocation8 + $0x10] sm:$0xff]  ;;  %v5103_v53 = vld [vmem:[%s5887_s0] sm:$0xff] }
 0x1e0   : > { %v4979_v60 = vpop.permute.xlu0 %783  ;;  %v898_v6 = vrot.slane %v4977_v44, %v5011_v22 }
 0x1e1   : > { %1173 = vxpose.xlu1.b32.cont [6/8] (short) (narrow) %v5974_v50, 64  ;;  %v932_v10 = vrot.slane %v4979_v60, %v5004_v63 }
 0x1e2   : > { %v899_v58 = vsel %vm853_vm4, %v898_v6, %v894_v61  ;;  %v5109_v61 = vld [vmem:[%s5887_s0 + $0x8] sm:$0xff] }
 0x1e3   : > { %v4982_v51 = vpop.permute.xlu1 %804 }
 0x1e4   : > { %v4984_v52 = vpop.permute.xlu0 %741  ;;  %v966_v50 = vrot.slane %v4982_v51, %v5001_v62 }
 0x1e5   : > { %1174 = vxpose.xlu1.b32.cont [7/8] (short) (narrow) %v5975_v33, 64  ;;  %v859_v44 = vrot.slane %v4984_v52, %v5016_v30  ;;  %v933_v52 = vsel %vm846_vm3, %v932_v10, %v928_v43 }
 0x1e6   : > { %v967_v19 = vsel %vm839_vm2, %v966_v50, %v962_v46 }
 0x1e7   : > { %v4987_v55 = vpop.permute.xlu1 %765  ;;  %v861_v62 = vsel %vm860_vm5, %v859_v44, %v854_v47 }
 0x1e8   : > { %v4989_v20 = vpop.permute.xlu0 %786  ;;  %v903_v42 = vrot.slane %v4987_v55, %v5016_v30 }
 0x1e9   : > { %1175 = vxpose.xlu1.b32.end [8/8] (short) (narrow) %v5976_v14, 64  ;;  %v937_v49 = vrot.slane %v4989_v20, %v5011_v22 }
 0x1ea   : > { %v904_v15 = vsel %vm860_vm5, %v903_v42, %v899_v58 }
 0x1eb   : > { %v4994_v21 = vpop.permute.xlu1 %807  ;;  %v938_v18 = vsel %vm853_vm4, %v937_v49, %v933_v52  ;;  %v5125_v49 = vld [vmem:[%s5887_s0 + $0x18] sm:$0xff]  ;;  %v5149_v52 = vld [vmem:[%s5887_s0 + $0x30] sm:$0xff] }
 0x1ec   : > { %v4996_v12 = vpop.permute.xlu0 %744  ;;  %v971_v33 = vrot.slane %v4994_v21, %v5004_v63 }
 0x1ed   : > { %v866_v55 = vrot.slane %v4996_v12, %v5035_v16 }
 0x1ef   : > { %v5006_v23 = vpop.permute.xlu1 %768 }
 0x1f0   : > { %v5008_v26 = vpop.permute.xlu0 %789  ;;  %v908_v60 = vrot.slane %v5006_v23, %v5035_v16 }
 0x1f1   : > { %v942_v54 = vrot.slane %v5008_v26, %v5016_v30  ;;  %v972_v26 = vsel %vm846_vm3, %v971_v33, %v967_v19 }
 0x1f2   : > { %v909_v63 = vsel %vm867_vm6, %v908_v60, %v904_v15 }
 0x1f3   : > { %v811_v2 = vpop.permute.xlu1 %810  ;;  %v943_v23 = vsel %vm860_vm5, %v942_v54, %v938_v18  ;;  %v5133_v54 = vld [vmem:[%s5887_s0 + $0x20] sm:$0xff]  ;;  %v5157_v18 = vld [vmem:[%s5887_s0 + $0x38] sm:$0xff] }
 0x1f4   : > { %v5028_v9 = vpop.permute.xlu0 %747  ;;  %v976_v59 = vrot.slane %v811_v2, %v5011_v22  ;;  %v868_v22 = vsel %vm867_vm6, %v866_v55, %v861_v62 }
 0x1f5   : > { %v873_v21 = vrot.slane %v5028_v9, %v872_v37 }
 0x1f7   : > { %v772_v39 = vpop.permute.xlu1 %771  ;;  %v875_v7 = vsel %vm874_vm7, %v873_v21, %v868_v22 }
 0x1f8   : > { %v793_v25 = vpop.permute.xlu0 %792  ;;  %v913_v20 = vrot.slane %v772_v39, %v872_v37 }
 0x1f9   : > { %v947_v36 = vrot.slane %v793_v25, %v5035_v16 }
 0x1fa   : > { %v914_v56 = vsel %vm874_vm7, %v913_v20, %v909_v63 }
 0x1fb   : > { %v814_v14 = vpop.permute.xlu1 %813  ;;  %v948_v3 = vsel %vm867_vm6, %v947_v36, %v943_v23  ;;  %v994_v0 = vsel %vm993_vm8, %v914_v56, %v875_v7  ;;  %v5141_v36 = vld [vmem:[%s5887_s0 + $0x28] sm:$0xff] }
 0x1fc   : > { %v796_v51 = vpop.permute.xlu0 %795  ;;  %v981_v12 = vrot.slane %v814_v14, %v5016_v30  ;;  %v977_v30 = vsel %vm853_vm4, %v976_v59, %v972_v26 }
 0x1fd   : > { %v952_v48 = vrot.slane %v796_v51, %v872_v37 }
 0x1fe   : > { %v982_v11 = vsel %vm860_vm5, %v981_v12, %v977_v30 }
 0x1ff   : > { %v817_v4 = vpop.permute.xlu1 %816  ;;  %v953_v31 = vsel %vm874_vm7, %v952_v48, %v948_v3 }
 0x200   : > { %v820_v57 = vpop.permute.xlu0 %819  ;;  %v986_v34 = vrot.slane %v817_v4, %v5035_v16  ;;  %v996_v9 = vsel %vm995_vm9, %v953_v31, %v994_v0  ;;  %v1574_v16 = vld [vmem:[#allocation8 + $0x28] sm:$0xff] }
 0x201   : > { %v991_v35 = vrot.slane %v820_v57, %v872_v37  ;;  %v1809_v57 = vld [vmem:[%s5889_s2 + $0x38] sm:$0xff]  ;;  %v1807_v0 = vld [vmem:[%s5889_s2 + $0x28] sm:$0xff] }
 0x202   : > { %v987_v1 = vsel %vm867_vm6, %v986_v34, %v982_v11  ;;  %3921 = vmatprep.subr.mxu1 %v1809_v57  ;;  %v1808_v34 = vld [vmem:[%s5889_s2 + $0x30] sm:$0xff] }
 0x203   : > { %v992_v2 = vsel %vm874_vm7, %v991_v35, %v987_v1 }
 0x204   : > { %v998_v5 = vsel %vm997_vm10, %v992_v2, %v996_v9 }
 0x205   : > { %3475 = vmatmul.mubr.msk.f32.vlgmr.msra.gmra.mxu0 %vm470_vm0, %v998_v5  ;;  %v1806_v5 = vld [vmem:[%s5889_s2 + $0x20] sm:$0xff] }
 0x206   : > { %3858 = vmatpush3.msra.mxu0 %v1576_v41  ;;  %v5117_v41 = vld [vmem:[%s5887_s0 + $0x10] sm:$0xff] }
 0x207   : > { %3859 = vmatprep.subr.mxu0 %v1575_v8 }
 0x208   : > { %3860 = vmatpush3.msra.mxu0 %v1575_v8 }
 0x209   : > { %3861 = vmatprep.subr.mxu0 %v1574_v16 }
 0x20a   : > { %3862 = vmatpush3.msra.mxu0 %v1574_v16 }
 0x20b   : > { %3863 = vmatprep.subr.mxu0 %v1573_v17 }
 0x20c   : > { %3864 = vmatpush3.msra.mxu0 %v1573_v17 }
 0x20d   : > { %3865 = vmatprep.subr.mxu0 %v1572_v24 }
 0x20e   : > { %3866 = vmatpush3.msra.mxu0 %v1572_v24 }
 0x20f   : > { %3867 = vmatprep.subr.mxu0 %v1571_v13 }
 0x210   : > { %3868 = vmatpush3.msra.mxu0 %v1571_v13  ;;  %v1805_v13 = vld [vmem:[%s5889_s2 + $0x18] sm:$0xff] }
 0x211   : > { %3869 = vmatprep.subr.mxu0 %v1570_v29 }
 0x212   : > { %3870 = vmatpush3.msra.mxu0 %v1570_v29 }
 0x213   : > { %3871 = vmatprep.subr.mxu0 %v1569_v32 }
 0x214   : > { %3872 = vmatpush3.msra.mxu0 %v1569_v32 }
 0x215   : > { %3985 = vmatprep.subr.mxu0 %v5920_v27 }
 0x21f   : > { %v1120_v37 = vpop.trf.xlu0 }
 0x220   : > { %v1216_v21 = vadd.f32 %v5103_v53, %v1120_v37 }
 0x223   : > { %v1121_v40 = vpop.trf.xlu0 }
 0x224   : > { %v1217_v63 = vadd.f32 %v5109_v61, %v1121_v40 }
 0x227   : > { %v1122_v45 = vpop.trf.xlu0 }
 0x228   : > { %v1218_v23 = vadd.f32 %v5117_v41, %v1122_v45 }
 0x229   : > { %v1088_v38 = vpop.trf.xlu1 }
 0x22a   : > { %v1208_v39 = vadd.f32 %v5103_v53, %v1088_v38 }
 0x22b   : > { %v1123_v25 = vpop.trf.xlu0 }
 0x22c   : > { %3809 = vmatprep.mubr.msk.f32.mxu1 %vm470_vm0, %v1208_v39  ;;  %3873 = vmatprep.mubr.msk.f32.mxu0 %vm470_vm0, %v1208_v39  ;;  %v1219_v56 = vadd.f32 %v5125_v49, %v1123_v25 }
 0x22d   : > { %v1089_v43 = vpop.trf.xlu1 }
 0x22e   : > { %v1209_v6 = vadd.f32 %v5109_v61, %v1089_v43 }
 0x22f   : > { %v1124_v10 = vpop.trf.xlu0 }
 0x230   : > { %3810 = vmatmul.mubr.msk.f32.vlgmr.msra.gmra.mxu1 %vm470_vm0, %v1209_v6  ;;  %3874 = vmatmul.mubr.msk.f32.vlgmr.msra.gmra.mxu0 %vm470_vm0, %v1209_v6  ;;  %v1220_v3 = vadd.f32 %v5133_v54, %v1124_v10 }
 0x231   : > { %v1090_v46 = vpop.trf.xlu1  ;;  %3986 = vmatpush3.msra.mxu0 %v1809_v57  ;;  %3922 = vmatpush3.msra.mxu1 %v1809_v57 }
 0x232   : > { %v1210_v47 = vadd.f32 %v5117_v41, %v1090_v46  ;;  %3987 = vmatprep.subr.mxu0 %v5920_v27  ;;  %3923 = vmatprep.subr.mxu1 %v1808_v34 }
 0x233   : > { %v1125_v42 = vpop.trf.xlu0  ;;  %3988 = vmatpush3.msra.mxu0 %v1808_v34  ;;  %3924 = vmatpush3.msra.mxu1 %v1808_v34 }
 0x234   : > { %3812 = vmatprep.mubr.msk.f32.mxu1 %vm470_vm0, %v1210_v47  ;;  %3876 = vmatprep.mubr.msk.f32.mxu0 %vm470_vm0, %v1210_v47  ;;  %v1221_v31 = vadd.f32 %v5141_v36, %v1125_v42 }
 0x235   : > { %v1091_v50 = vpop.trf.xlu1  ;;  %3989 = vmatprep.subr.mxu0 %v5920_v27  ;;  %3925 = vmatprep.subr.mxu1 %v1807_v0 }
 0x236   : > { %v1211_v44 = vadd.f32 %v5125_v49, %v1091_v50  ;;  %3990 = vmatpush3.msra.mxu0 %v1807_v0  ;;  %3926 = vmatpush3.msra.mxu1 %v1807_v0 }
 0x237   : > { %v1126_v60 = vpop.trf.xlu0  ;;  %3991 = vmatprep.subr.mxu0 %v5920_v27  ;;  %3927 = vmatprep.subr.mxu1 %v1806_v5 }
 0x238   : > { %3813 = vmatmul.mubr.msk.f32.gmra.mxu1 %vm470_vm0, %v1211_v44  ;;  %3877 = vmatmul.mubr.msk.f32.gmra.mxu0 %vm470_vm0, %v1211_v44  ;;  %v1222_v35 = vadd.f32 %v5149_v52, %v1126_v60  ;;  %v1802_v44 = vld [vmem:[%s5889_s2] sm:$0xff] }
 0x239   : > { %v1092_v33 = vpop.trf.xlu1  ;;  %3992 = vmatpush3.msra.mxu0 %v1806_v5  ;;  %3928 = vmatpush3.msra.mxu1 %v1806_v5 }
 0x23a   : > { %v1212_v55 = vadd.f32 %v5133_v54, %v1092_v33  ;;  %3993 = vmatprep.subr.mxu0 %v5920_v27  ;;  %3929 = vmatprep.subr.mxu1 %v1805_v13 }
 0x23b   : > { %v1127_v20 = vpop.trf.xlu0  ;;  %3994 = vmatpush3.msra.mxu0 %v1805_v13  ;;  %3930 = vmatpush3.msra.mxu1 %v1805_v13 }
 0x23c   : > { %3815 = vmatprep.mubr.msk.f32.mxu1 %vm470_vm0, %v1212_v55  ;;  %3879 = vmatprep.mubr.msk.f32.mxu0 %vm470_vm0, %v1212_v55  ;;  %v1223_v11 = vadd.f32 %v5157_v18, %v1127_v20 }
 0x23d   : > { %v1093_v14 = vpop.trf.xlu1  ;;  %3995 = vmatprep.subr.mxu0 %v5920_v27 }
 0x23e   : > { %v1213_v51 = vadd.f32 %v5141_v36, %v1093_v14 }
 0x23f   : > { %v1152_v58 = vpop.trf.xlu0 }
 0x240   : > { %3816 = vmatmul.mubr.msk.f32.gmra.mxu1 %vm470_vm0, %v1213_v51  ;;  %3880 = vmatmul.mubr.msk.f32.gmra.mxu0 %vm470_vm0, %v1213_v51  ;;  %v1224_v1 = vadd.f32 %v5103_v53, %v1152_v58  ;;  %v5282_v51 = vsub.s32 0, %v4991_v28 }
 0x241   : > { %v1094_v59 = vpop.trf.xlu1 }
 0x242   : > { %v1214_v48 = vadd.f32 %v5149_v52, %v1094_v59 }
 0x243   : > { %v1153_v15 = vpop.trf.xlu0 }
 0x244   : > { %3818 = vmatprep.mubr.msk.f32.mxu1 %vm470_vm0, %v1214_v48  ;;  %3882 = vmatprep.mubr.msk.f32.mxu0 %vm470_vm0, %v1214_v48  ;;  %v1225_v9 = vadd.f32 %v5109_v61, %v1153_v15 }
 0x245   : > { %v1095_v12 = vpop.trf.xlu1 }
 0x246   : > { %v1215_v19 = vadd.f32 %v5157_v18, %v1095_v12 }
 0x247   : > { %v1154_v62 = vpop.trf.xlu0 }
 0x248   : > { %3819 = vmatmul.mubr.msk.f32.gmra.mxu1 %vm470_vm0, %v1215_v19  ;;  %3883 = vmatmul.mubr.msk.f32.gmra.mxu0 %vm470_vm0, %v1215_v19  ;;  %v1226_v8 = vadd.f32 %v5117_v41, %v1154_v62 }
 0x249   : > { %3821 = vmatprep.mubr.msk.f32.mxu1 %vm470_vm0, %v1216_v21  ;;  %v5168_v26 = vpop.trf.xlu1  ;;  %3885 = vmatprep.mubr.msk.f32.mxu0 %vm470_vm0, %v1216_v21 }
 0x24a   : > { %v1232_v39 = vadd.f32 %v5103_v53, %v5168_v26 }
 0x24b   : > { %v1155_v22 = vpop.trf.xlu0 }
 0x24c   : > { %3822 = vmatmul.mubr.msk.f32.gmra.mxu1 %vm470_vm0, %v1217_v63  ;;  %3886 = vmatmul.mubr.msk.f32.gmra.mxu0 %vm470_vm0, %v1217_v63  ;;  %v1227_v24 = vadd.f32 %v5125_v49, %v1155_v22 }
 0x24d   : > { %3824 = vmatprep.mubr.msk.f32.mxu1 %vm470_vm0, %v1218_v23  ;;  %v5176_v4 = vpop.trf.xlu1  ;;  %3888 = vmatprep.mubr.msk.f32.mxu0 %vm470_vm0, %v1218_v23 }
 0x24e   : > { %v1233_v43 = vadd.f32 %v5109_v61, %v5176_v4 }
 0x24f   : > { %v1156_v30 = vpop.trf.xlu0 }
 0x250   : > { %3825 = vmatmul.mubr.msk.f32.gmra.mxu1 %vm470_vm0, %v1219_v56  ;;  %3889 = vmatmul.mubr.msk.f32.gmra.mxu0 %vm470_vm0, %v1219_v56  ;;  %v1228_v29 = vadd.f32 %v5133_v54, %v1156_v30 }
 0x251   : > { %3827 = vmatprep.mubr.msk.f32.mxu1 %vm470_vm0, %v1220_v3  ;;  %3891 = vmatprep.mubr.msk.f32.mxu0 %vm470_vm0, %v1220_v3  ;;  %v1186_v7 = vpop.trf.xlu1 }
 0x252   : > { %v1234_v6 = vadd.f32 %v5117_v41, %v1186_v7  ;;  %v1804_v41 = vld [vmem:[%s5889_s2 + $0x10] sm:$0xff] }
 0x253   : > { %v1157_v2 = vpop.trf.xlu0  ;;  %3931 = vmatprep.subr.mxu1 %v1804_v41  ;;  %3996 = vmatpush3.msra.mxu0 %v1804_v41 }
 0x254   : > { %3828 = vmatmul.mubr.msk.f32.gmra.mxu1 %vm470_vm0, %v1221_v31  ;;  %3892 = vmatmul.mubr.msk.f32.gmra.mxu0 %vm470_vm0, %v1221_v31  ;;  %v1229_v37 = vadd.f32 %v5141_v36, %v1157_v2 }
 0x255   : > { %3830 = vmatprep.mubr.msk.f32.mxu1 %vm470_vm0, %v1222_v35  ;;  %3894 = vmatprep.mubr.msk.f32.mxu0 %vm470_vm0, %v1222_v35  ;;  %v1187_v16 = vpop.trf.xlu1 }
 0x256   : > { %v1235_v53 = vadd.f32 %v5125_v49, %v1187_v16  ;;  %v1803_v49 = vld [vmem:[%s5889_s2 + $0x8] sm:$0xff]  ;;  %3932 = vmatpush3.msra.mxu1 %v1804_v41  ;;  %3997 = vmatprep.subr.mxu0 %v5920_v27 }
 0x257   : > { %v1158_v17 = vpop.trf.xlu0  ;;  %3933 = vmatprep.subr.mxu1 %v1803_v49  ;;  %3998 = vmatpush3.msra.mxu0 %v1803_v49 }
 0x258   : > { %3831 = vmatmul.mubr.msk.f32.gmra.mxu1 %vm470_vm0, %v1223_v11  ;;  %3895 = vmatmul.mubr.msk.f32.gmra.mxu0 %vm470_vm0, %v1223_v11  ;;  %v1230_v40 = vadd.f32 %v5149_v52, %v1158_v17 }
 0x259   : > { %3833 = vmatprep.mubr.msk.f32.mxu1 %vm470_vm0, %v1224_v1  ;;  %3897 = vmatprep.mubr.msk.f32.mxu0 %vm470_vm0, %v1224_v1  ;;  %v1188_v32 = vpop.trf.xlu1 }
 0x25a   : > { %v1236_v46 = vadd.f32 %v5133_v54, %v1188_v32  ;;  %3934 = vmatpush3.msra.mxu1 %v1803_v49  ;;  %3999 = vmatprep.subr.mxu0 %v5920_v27  ;;  %v4476_v54 = vmov 1966171168  }
 0x25b   : > { %v1159_v45 = vpop.trf.xlu0  ;;  %3935 = vmatprep.subr.mxu1 %v1802_v44  ;;  %4000 = vmatpush3.msra.mxu0 %v1802_v44  ;;  %v1813_v33 = vunpack.c.l.s4 %v4476_v54 }
 0x25c   : > { %3834 = vmatmul.mubr.msk.f32.gmra.mxu1 %vm470_vm0, %v1225_v9  ;;  %3898 = vmatmul.mubr.msk.f32.gmra.mxu0 %vm470_vm0, %v1225_v9  ;;  %v1231_v38 = vadd.f32 %v5157_v18, %v1159_v45 }
 0x25d   : > { %3836 = vmatprep.mubr.msk.f32.mxu1 %vm470_vm0, %v1226_v8  ;;  %3900 = vmatprep.mubr.msk.f32.mxu0 %vm470_vm0, %v1226_v8  ;;  %v1189_v25 = vpop.trf.xlu1  ;;  %v1814_v55 = vunpack.c.0.s8 %v1813_v33 }
 0x25e   : > { %v1237_v61 = vadd.f32 %v5141_v36, %v1189_v25  ;;  %3936 = vmatpush3.msra.mxu1 %v1802_v44 }
 0x25f   : > { %v1817_v20 = vsub.s32 %v1814_v55, %v4991_v28 }
 0x260   : > { %3837 = vmatmul.mubr.msk.f32.gmra.mxu1 %vm470_vm0, %v1227_v24  ;;  %3901 = vmatmul.mubr.msk.f32.gmra.mxu0 %vm470_vm0, %v1227_v24 }
 0x261   : > { %3839 = vmatprep.mubr.msk.f32.mxu1 %vm470_vm0, %v1228_v29  ;;  %3903 = vmatprep.mubr.msk.f32.mxu0 %vm470_vm0, %v1228_v29  ;;  %v1190_v10 = vpop.trf.xlu1 }
 0x262   : > { %v1238_v47 = vadd.f32 %v5149_v52, %v1190_v10 }
 0x264   : > { %3840 = vmatmul.mubr.msk.f32.gmra.mxu1 %vm470_vm0, %v1229_v37  ;;  %3904 = vmatmul.mubr.msk.f32.gmra.mxu0 %vm470_vm0, %v1229_v37 }
 0x265   : > { %3842 = vmatprep.mubr.msk.f32.mxu1 %vm470_vm0, %v1230_v40  ;;  %3906 = vmatprep.mubr.msk.f32.mxu0 %vm470_vm0, %v1230_v40  ;;  %v1191_v42 = vpop.trf.xlu1 }
 0x266   : > { %v1239_v50 = vadd.f32 %v5157_v18, %v1191_v42 }
 0x268   : > { %3843 = vmatmul.mubr.msk.f32.gmra.mxu1 %vm470_vm0, %v1231_v38  ;;  %3907 = vmatmul.mubr.msk.f32.gmra.mxu0 %vm470_vm0, %v1231_v38 }
 0x269   : > { %3845 = vmatprep.mubr.msk.f32.mxu1 %vm470_vm0, %v1232_v39  ;;  %3909 = vmatprep.mubr.msk.f32.mxu0 %vm470_vm0, %v1232_v39 }
 0x26c   : > { %3846 = vmatmul.mubr.msk.f32.gmra.mxu1 %vm470_vm0, %v1233_v43  ;;  %3910 = vmatmul.mubr.msk.f32.gmra.mxu0 %vm470_vm0, %v1233_v43 }
 0x26d   : > { %3848 = vmatprep.mubr.msk.f32.mxu1 %vm470_vm0, %v1234_v6  ;;  %3912 = vmatprep.mubr.msk.f32.mxu0 %vm470_vm0, %v1234_v6 }
 0x270   : > { %3849 = vmatmul.mubr.msk.f32.gmra.mxu1 %vm470_vm0, %v1235_v53  ;;  %3913 = vmatmul.mubr.msk.f32.gmra.mxu0 %vm470_vm0, %v1235_v53 }
 0x271   : > { %3851 = vmatprep.mubr.msk.f32.mxu1 %vm470_vm0, %v1236_v46  ;;  %3915 = vmatprep.mubr.msk.f32.mxu0 %vm470_vm0, %v1236_v46 }
 0x274   : > { %3852 = vmatmul.mubr.msk.f32.gmra.mxu1 %vm470_vm0, %v1237_v61  ;;  %3916 = vmatmul.mubr.msk.f32.gmra.mxu0 %vm470_vm0, %v1237_v61 }
 0x275   : > { %3854 = vmatprep.mubr.msk.f32.mxu1 %vm470_vm0, %v1238_v47  ;;  %3918 = vmatprep.mubr.msk.f32.mxu0 %vm470_vm0, %v1238_v47 }
 0x278   : > { %3855 = vmatmul.mubr.msk.f32.gmra.mxu1 %vm470_vm0, %v1239_v50  ;;  %3919 = vmatmul.mubr.msk.f32.gmra.mxu0 %vm470_vm0, %v1239_v50 }
 0x279   : > { %4001 = vmatprep.mubr.msk.f32.mxu0 %vm4474_vm11, %v5920_v27 }
 0x2c5   : > { %v5275_v60 = vpop.f32.mrf.mxu0 }
 0x2c6   : > { %2209 = vrot.lane.b32.xlu0 %v5275_v60, %s4475_s29  ;;  %v1818_v36 = vrot.slane %v5275_v60, %v1817_v20 }
 0x2c8   : > { %v1826_v14 = vrot.slane %v1818_v36, %v1817_v20  ;;  %v1819_v26 = vcombine.high %v1818_v36, %v1818_v36 }
 0x2ca   : > { %v1839_v52 = vrot.slane %v1826_v14, %v5282_v51  ;;  %v1833_v56 = vrot.slane %v1819_v26, %v1817_v20  ;;  %v1834_v24 = vcombine.high %v1826_v14, %v1826_v14 }
 0x2cc   : > { %v1843_v31 = vrot.slane %v1833_v56, %v5282_v51  ;;  %v1847_v40 = vrot.slane %v1834_v24, %v5282_v51  ;;  %v1835_v42 = vcombine.high %v1833_v56, %v1833_v56 }
 0x2ce   : > { %v1851_v33 = vrot.slane %v1835_v42, %v5282_v51 }
 0x2f0   : > { %v3811_v58 = vpop.f32.mrf.mxu1 }
 0x2f1   : > { %v1857_v15 = vmul.f32 %v3811_v58, %v1839_v52 }
 0x2f2   : > { %v1410_v59 = vpop.f32.mrf.mxu1 }
 0x2f3   : > { %v1856_v48 = vmul.f32 %v1839_v52, %v1410_v59 }
 0x2f5   : > { %3937 = vmatprep.mubr.msk.f32.mxu1 %vm470_vm0, %v1856_v48 }
 0x2f6   : > { %3938 = vmatmul.mubr.msk.f32.vlgmr.msra.gmra.mxu1 %vm470_vm0, %v1857_v15 }
 0x2f8   : > { %v3814_v18 = vpop.f32.mrf.mxu1 }
 0x2f9   : > { %v1859_v19 = vmul.f32 %v3814_v18, %v1839_v52 }
 0x2fa   : > { %v1420_v21 = vpop.f32.mrf.mxu1 }
 0x2fb   : > { %v1858_v12 = vmul.f32 %v1839_v52, %v1420_v21 }
 0x2fd   : > { %3940 = vmatprep.mubr.msk.f32.mxu1 %vm470_vm0, %v1858_v12 }
 0x2fe   : > { %3941 = vmatmul.mubr.msk.f32.gmra.mxu1 %vm470_vm0, %v1859_v19 }
 0x300   : > { %v3817_v28 = vpop.f32.mrf.mxu1 }
 0x301   : > { %v1861_v23 = vmul.f32 %v3817_v28, %v1839_v52 }
 0x302   : > { %v1430_v62 = vpop.f32.mrf.mxu1 }
 0x303   : > { %v1860_v63 = vmul.f32 %v1839_v52, %v1430_v62 }
 0x305   : > { %3943 = vmatprep.mubr.msk.f32.mxu1 %vm470_vm0, %v1860_v63 }
 0x306   : > { %3944 = vmatmul.mubr.msk.f32.gmra.mxu1 %vm470_vm0, %v1861_v23 }
 0x308   : > { %v3820_v22 = vpop.f32.mrf.mxu1 }
 0x309   : > { %v1863_v57 = vmul.f32 %v3820_v22, %v1839_v52 }
 0x30a   : > { %v1440_v3 = vpop.f32.mrf.mxu1 }
 0x30b   : > { %v1862_v4 = vmul.f32 %v1839_v52, %v1440_v3 }
 0x30c   : > { %v3823_v30 = vpop.f32.mrf.mxu1 }
 0x30d   : > { %3946 = vmatprep.mubr.msk.f32.mxu1 %vm470_vm0, %v1862_v4  ;;  %v1865_v7 = vmul.f32 %v3823_v30, %v1843_v31 }
 0x30e   : > { %v1450_v34 = vpop.f32.mrf.mxu1  ;;  %3947 = vmatmul.mubr.msk.f32.gmra.mxu1 %vm470_vm0, %v1863_v57 }
 0x30f   : > { %v1864_v35 = vmul.f32 %v1843_v31, %v1450_v34 }
 0x310   : > { %v3826_v11 = vpop.f32.mrf.mxu1 }
 0x311   : > { %3949 = vmatprep.mubr.msk.f32.mxu1 %vm470_vm0, %v1864_v35  ;;  %v1867_v2 = vmul.f32 %v3826_v11, %v1843_v31 }
 0x312   : > { %v1460_v0 = vpop.f32.mrf.mxu1  ;;  %3950 = vmatmul.mubr.msk.f32.gmra.mxu1 %vm470_vm0, %v1865_v7 }
 0x313   : > { %v1866_v1 = vmul.f32 %v1843_v31, %v1460_v0 }
 0x314   : > { %v3829_v9 = vpop.f32.mrf.mxu1 }
 0x315   : > { %3952 = vmatprep.mubr.msk.f32.mxu1 %vm470_vm0, %v1866_v1  ;;  %v1869_v16 = vmul.f32 %v3829_v9, %v1843_v31 }
 0x316   : > { %v1470_v5 = vpop.f32.mrf.mxu1  ;;  %3953 = vmatmul.mubr.msk.f32.gmra.mxu1 %vm470_vm0, %v1867_v2 }
 0x317   : > { %v1868_v8 = vmul.f32 %v1843_v31, %v1470_v5 }
 0x318   : > { %v3832_v17 = vpop.f32.mrf.mxu1 }
 0x319   : > { %3955 = vmatprep.mubr.msk.f32.mxu1 %vm470_vm0, %v1868_v8  ;;  %v1871_v32 = vmul.f32 %v3832_v17, %v1843_v31 }
 0x31a   : > { %v1480_v13 = vpop.f32.mrf.mxu1  ;;  %3956 = vmatmul.mubr.msk.f32.gmra.mxu1 %vm470_vm0, %v1869_v16 }
 0x31b   : > { %v1870_v29 = vmul.f32 %v1843_v31, %v1480_v13  ;;  %v5337_v31 = vpop.f32.mrf.mxu0 }
 0x31c   : > { %v3835_v37 = vpop.f32.mrf.mxu1  ;;  %5977 = vst [vmem:[#allocation16_spill] sm:$0xff] %v5337_v31 }
 0x31d   : > { %3958 = vmatprep.mubr.msk.f32.mxu1 %vm470_vm0, %v1870_v29  ;;  %v1873_v39 = vmul.f32 %v3835_v37, %v1847_v40  ;;  %v5341_v35 = vpop.f32.mrf.mxu0 }
 0x31e   : > { %v1490_v45 = vpop.f32.mrf.mxu1  ;;  %3959 = vmatmul.mubr.msk.f32.gmra.mxu1 %vm470_vm0, %v1871_v32 }
 0x31f   : > { %v1872_v38 = vmul.f32 %v1847_v40, %v1490_v45  ;;  %v5345_v11 = vpop.f32.mrf.mxu0 }
 0x320   : > { %v3838_v25 = vpop.f32.mrf.mxu1 }
 0x321   : > { %3961 = vmatprep.mubr.msk.f32.mxu1 %vm470_vm0, %v1872_v38  ;;  %v1875_v10 = vmul.f32 %v3838_v25, %v1847_v40  ;;  %v5349_v1 = vpop.f32.mrf.mxu0 }
 0x322   : > { %v1500_v43 = vpop.f32.mrf.mxu1  ;;  %3962 = vmatmul.mubr.msk.f32.gmra.mxu1 %vm470_vm0, %v1873_v39  ;;  %5978 = vst [vmem:[#allocation25_spill] sm:$0xff] %v5349_v1 }
 0x323   : > { %v1874_v6 = vmul.f32 %v1847_v40, %v1500_v43  ;;  %v5353_v9 = vpop.f32.mrf.mxu0 }
 0x324   : > { %v3841_v53 = vpop.f32.mrf.mxu1 }
 0x325   : > { %3964 = vmatprep.mubr.msk.f32.mxu1 %vm470_vm0, %v1874_v6  ;;  %v1877_v41 = vmul.f32 %v3841_v53, %v1847_v40  ;;  %v5357_v8 = vpop.f32.mrf.mxu0 }
 0x326   : > { %v1510_v46 = vpop.f32.mrf.mxu1  ;;  %3965 = vmatmul.mubr.msk.f32.gmra.mxu1 %vm470_vm0, %v1875_v10  ;;  %5979 = vst [vmem:[#allocation18_spill] sm:$0xff] %v5357_v8 }
 0x327   : > { %v1876_v61 = vmul.f32 %v1847_v40, %v1510_v46  ;;  %v5361_v17 = vpop.f32.mrf.mxu0 }
 0x328   : > { %v3844_v47 = vpop.f32.mrf.mxu1  ;;  %5980 = vst [vmem:[#allocation17_spill] sm:$0xff] %v5361_v17 }
 0x329   : > { %3967 = vmatprep.mubr.msk.f32.mxu1 %vm470_vm0, %v1876_v61  ;;  %v1879_v44 = vmul.f32 %v3844_v47, %v1847_v40  ;;  %v5365_v13 = vpop.f32.mrf.mxu0 }
 0x32a   : > { %v1520_v49 = vpop.f32.mrf.mxu1  ;;  %3968 = vmatmul.mubr.msk.f32.gmra.mxu1 %vm470_vm0, %v1877_v41  ;;  %5981 = vst [vmem:[#allocation20_spill] sm:$0xff] %v5365_v13 }
 0x32b   : > { %v1878_v50 = vmul.f32 %v1847_v40, %v1520_v49  ;;  %v5369_v32 = vpop.f32.mrf.mxu0  ;;  %v5376_v40 = vld [vmem:[%s5890_s3] sm:$0xf] }
 0x32c   : > { %v3847_v54 = vpop.f32.mrf.mxu1  ;;  %5982 = vst [vmem:[#allocation19_spill] sm:$0xff] %v5369_v32  ;;  %4083 = vmatprep.subr.msk.mxu1 %vm2711_vm12, %v5376_v40  ;;  %4004 = vmatprep.subr.msk.mxu0 %vm2711_vm12, %v5376_v40 }
 0x32d   : > { %3970 = vmatprep.mubr.msk.f32.mxu1 %vm470_vm0, %v1878_v50  ;;  %v1881_v36 = vmul.f32 %v3847_v54, %v1851_v33  ;;  %v5382_v45 = vpop.f32.mrf.mxu0  ;;  %4084 = vmatpush3.msk.msra.mxu1 %vm2711_vm12, %v5376_v40 }
 0x32e   : > { %v1530_v55 = vpop.f32.mrf.mxu1  ;;  %3971 = vmatmul.mubr.msk.f32.gmra.mxu1 %vm470_vm0, %v1879_v44  ;;  %4054 = vmatprep.subr.mxu1 %v5920_v27 }
 0x32f   : > { %v1880_v20 = vmul.f32 %v1851_v33, %v1530_v55  ;;  %v5392_v39 = vpop.f32.mrf.mxu0 }
 0x330   : > { %v3850_v14 = vpop.f32.mrf.mxu1 }
 0x331   : > { %3973 = vmatprep.mubr.msk.f32.mxu1 %vm470_vm0, %v1880_v20  ;;  %v1883_v59 = vmul.f32 %v3850_v14, %v1851_v33  ;;  %v5394_v25 = vpop.f32.mrf.mxu0 }
 0x332   : > { %v1540_v58 = vpop.f32.mrf.mxu1  ;;  %3974 = vmatmul.mubr.msk.f32.gmra.mxu1 %vm470_vm0, %v1881_v36 }
 0x333   : > { %v1882_v52 = vmul.f32 %v1851_v33, %v1540_v58  ;;  %v5398_v6 = vpop.f32.mrf.mxu0 }
 0x334   : > { %v3853_v48 = vpop.f32.mrf.mxu1 }
 0x335   : > { %3976 = vmatprep.mubr.msk.f32.mxu1 %vm470_vm0, %v1882_v52  ;;  %v1885_v21 = vmul.f32 %v3853_v48, %v1851_v33  ;;  %v5402_v53 = vpop.f32.mrf.mxu0 }
 0x336   : > { %v1550_v15 = vpop.f32.mrf.mxu1  ;;  %3977 = vmatmul.mubr.msk.f32.gmra.mxu1 %vm470_vm0, %v1883_v59  ;;  %5983 = vst [vmem:[#allocation22_spill] sm:$0xff] %v5402_v53 }
 0x337   : > { %v1884_v18 = vmul.f32 %v1851_v33, %v1550_v15  ;;  %v5406_v61 = vpop.f32.mrf.mxu0 }
 0x338   : > { %v3856_v12 = vpop.f32.mrf.mxu1  ;;  %v2210_v19 = vpop.permute.xlu0 %2209  ;;  %5984 = vst [vmem:[#allocation21_spill] sm:$0xff] %v5406_v61 }
 0x339   : > { %v2212_v28 = vmul.f32 %v2210_v19, %v5275_v60  ;;  %3979 = vmatprep.mubr.msk.f32.mxu1 %vm470_vm0, %v1884_v18  ;;  %v1887_v23 = vmul.f32 %v3856_v12, %v1851_v33  ;;  %v5408_v41 = vpop.f32.mrf.mxu0 }
 0x33a   : > { %v1560_v62 = vpop.f32.mrf.mxu1  ;;  %3980 = vmatmul.mubr.msk.f32.gmra.mxu1 %vm470_vm0, %v1885_v21  ;;  %5985 = vst [vmem:[#allocation24_spill] sm:$0xff] %v5408_v41 }
 0x33b   : > { %v1886_v63 = vmul.f32 %v1851_v33, %v1560_v62  ;;  %2214 = vrot.lane.b32.xlu1 %v2212_v28, %s4475_s29  ;;  %v5412_v42 = vpop.f32.mrf.mxu0  ;;  %s4393_s29 = sshll.u32 %s4477_s17, 4  ;;  %s4394_s29 = int_to_ptr.vmem [resolvable:$false] %s4393_s29 }
 0x33c   : > { %5986 = vst [vmem:[#allocation23_spill] sm:$0xff] %v5412_v42  ;;  %s4395_s26 = scalar_lea.vmem %s4394_s29, 128  ;;  %p4396_p12 = scmp.lt.s32.totalorder %s3349_s5, %s4394_s29 }
 0x33d   : > { %3982 = vmatprep.mubr.msk.f32.mxu1 %vm470_vm0, %v1886_v63  ;;  %v5416_v50 = vpop.f32.mrf.mxu0  ;;  %p4397_p13 = scmp.lt.s32.totalorder %s4395_s26, %s4389_s24 }
 0x33e   : > { %3983 = vmatmul.mubr.msk.f32.gmra.mxu1 %vm470_vm0, %v1887_v23  ;;  %5987 = vst [vmem:[#allocation27_spill] sm:$0xff] %v5416_v50 }
 0x33f   : > { %v5420_v54 = vpop.f32.mrf.mxu0  ;;  %p4398_p0 = por %p4397_p13, %p4396_p12 }
 0x340   : > { %5988 = vst [vmem:[#allocation26_spill] sm:$0xff] %v5420_v54 }
 0x341   : > { %v5424_v55 = vpop.f32.mrf.mxu0  ;;  %p4399_p11 = pnand %p4398_p0, %p4392_p7 }
 0x342   : > { %5989 = vst [vmem:[#allocation28_spill] sm:$0xff] %v5424_v55 }
 0x343   : > { %v5434_v52 = vpop.f32.mrf.mxu0 }
 0x344   : > { %5990 = vst [vmem:[#allocation29_spill] sm:$0xff] %v5434_v52 }
 0x345   : > { %v5444_v28 = vpop.f32.mrf.mxu0 }
 0x346   : > { %5991 = vst [vmem:[#allocation31_spill] sm:$0xff] %v5444_v28 }
 0x3ad   : > { %v2215_v26 = vpop.permute.xlu1 %2214 }
 0x3ae   : > { %4002 = vmatmul.mubr.msk.f32.vlgmr.msra.gmra.mxu0 %vm470_vm0, %v2215_v26 }
 0x3af   : > { %4005 = vmatpush3.msk.msra.mxu0 %vm2711_vm12, %v5376_v40 }
 0x3b0   : > { %4064 = vmatprep.subr.mxu0 %v5920_v27 }
 0x3b6   : > { %v5323_v22 = vpop.f32.mrf.mxu1 }
 0x3b7   : > { %v2290_v14 = vsel %vm2288_vm13, %v5323_v22, -inf }
 0x3b8   : > { %v5325_v56 = vpop.f32.mrf.mxu1 }
 0x3b9   : > { %v2289_v20 = vsel %vm2288_vm13, %v5325_v56, -inf }
 0x3ba   : > { %v2291_v59 = vmax.f32 %v2289_v20, %v2290_v14  ;;  %v5452_v14 = vpop.f32.mrf.mxu0 }
 0x3bb   : > { %5992 = vst [vmem:[#allocation30_spill] sm:$0xff] %v5452_v14 }
 0x3be   : > { %v5327_v60 = vpop.f32.mrf.mxu1 }
 0x3bf   : > { %v2294_v62 = vsel %vm2288_vm13, %v5327_v60, -inf }
 0x3c0   : > { %v5329_v3 = vpop.f32.mrf.mxu1 }
 0x3c1   : > { %v2292_v58 = vsel %vm2288_vm13, %v5329_v3, -inf }
 0x3c2   : > { %v2293_v15 = vmax.f32 %v2291_v59, %v2292_v58 }
 0x3c4   : > { %v2295_v26 = vmax.f32 %v2293_v15, %v2294_v62 }
 0x3c6   : > { %v5331_v4 = vpop.f32.mrf.mxu1 }
 0x3c8   : > { %v5333_v57 = vpop.f32.mrf.mxu1 }
 0x3c9   : > { %v2296_v63 = vsel %vm2288_vm13, %v5333_v57, -inf }
 0x3ca   : > { %v2297_v58 = vmax.f32 %v2295_v26, %v2296_v63  ;;  %v5470_v26 = vpop.f32.mrf.mxu0 }
 0x3cb   : > { %5993 = vst [vmem:[#allocation32_spill] sm:$0xff] %v5470_v26 }
 0x3ce   : > { %v5335_v30 = vpop.f32.mrf.mxu1 }
 0x3d0   : > { %v5339_v34 = vpop.f32.mrf.mxu1 }
 0x3d2   : > { %v5343_v7 = vpop.f32.mrf.mxu1 }
 0x3d3   : > { %v2311_v18 = vsel %vm2288_vm13, %v5343_v7, -inf }
 0x3d4   : > { %v5347_v0 = vpop.f32.mrf.mxu1 }
 0x3d5   : > { %v2310_v48 = vsel %vm2288_vm13, %v5347_v0, -inf }
 0x3d6   : > { %v5351_v2 = vpop.f32.mrf.mxu1  ;;  %v2312_v19 = vmax.f32 %v2310_v48, %v2311_v18 }
 0x3d7   : > { %v2315_v59 = vsel %vm2288_vm13, %v5351_v2, -inf }
 0x3d8   : > { %v5355_v5 = vpop.f32.mrf.mxu1 }
 0x3d9   : > { %v2313_v21 = vsel %vm2288_vm13, %v5355_v5, -inf }
 0x3da   : > { %v5359_v16 = vpop.f32.mrf.mxu1  ;;  %v2314_v23 = vmax.f32 %v2312_v19, %v2313_v21  ;;  %v2298_v19 = vsel %vm2288_vm13, %v5331_v4, -inf }
 0x3dc   : > { %v5363_v24 = vpop.f32.mrf.mxu1  ;;  %v2316_v18 = vmax.f32 %v2314_v23, %v2315_v59  ;;  %v2299_v23 = vmax.f32 %v2297_v58, %v2298_v19  ;;  %v2300_v59 = vsel %vm2288_vm13, %v5339_v34, -inf  ;;  %v2319_v58 = vsel %vm2288_vm13, %v5359_v16, -inf }
 0x3dd   : > { %v2317_v27 = vsel %vm2288_vm13, %v5363_v24, -inf }
 0x3de   : > { %v5367_v29 = vpop.f32.mrf.mxu1  ;;  %v2318_v13 = vmax.f32 %v2316_v18, %v2317_v27 }
 0x3df   : > { %v2323_v55 = vsel %vm2288_vm13, %v5367_v29, -inf }
 0x3e0   : > { %v5371_v37 = vpop.f32.mrf.mxu1  ;;  %v2320_v18 = vmax.f32 %v2318_v13, %v2319_v58 }
 0x3e2   : > { %v5390_v38 = vpop.f32.mrf.mxu1 }
 0x3e3   : > { %v2332_v31 = vsel %vm2288_vm13, %v5390_v38, -inf }
 0x3e4   : > { %v5396_v43 = vpop.f32.mrf.mxu1 }
 0x3e5   : > { %v2331_v48 = vsel %vm2288_vm13, %v5396_v43, -inf }
 0x3e6   : > { %v5400_v10 = vpop.f32.mrf.mxu1  ;;  %v2333_v62 = vmax.f32 %v2331_v48, %v2332_v31  ;;  %v2301_v31 = vmax.f32 %v2299_v23, %v2300_v59  ;;  %v5480_v48 = vpop.f32.mrf.mxu0 }
 0x3e7   : > { %5994 = vst [vmem:[#allocation33_spill] sm:$0xff] %v5480_v48  ;;  %v2336_v19 = vsel %vm2288_vm13, %v5400_v10, -inf }
 0x3e8   : > { %v5404_v46 = vpop.f32.mrf.mxu1  ;;  %v5496_v26 = vpop.f32.mrf.mxu0 }
 0x3e9   : > { %v2334_v15 = vsel %vm2288_vm13, %v5404_v46, -inf  ;;  %5995 = vst [vmem:[#allocation34_spill] sm:$0xff] %v5496_v26 }
 0x3ea   : > { %v5410_v47 = vpop.f32.mrf.mxu1  ;;  %v2335_v14 = vmax.f32 %v2333_v62, %v2334_v15  ;;  %v2302_v62 = vsel %vm2288_vm13, %v5335_v30, -inf  ;;  %v5502_v52 = vpop.f32.mrf.mxu0 }
 0x3eb   : > { %v2303_v59 = vmax.f32 %v2301_v31, %v2302_v62  ;;  %5996 = vst [vmem:[#allocation35_spill] sm:$0xff] %v5502_v52  ;;  %v2340_v31 = vsel %vm2288_vm13, %v5410_v47, -inf }
 0x3ec   : > { %v5414_v49 = vpop.f32.mrf.mxu1  ;;  %v2337_v15 = vmax.f32 %v2335_v14, %v2336_v19 }
 0x3ed   : > { %v2304_v19 = vrot.slane %v2303_v59, 4 }
 0x3ee   : > { %v5418_v44 = vpop.f32.mrf.mxu1 }
 0x3f0   : > { %v5422_v33 = vpop.f32.mrf.mxu1 }
 0x3f2   : > { %v5428_v36 = vpop.f32.mrf.mxu1 }
 0x3f3   : > { %v2353_v28 = vsel %vm2288_vm13, %v5428_v36, -inf }
 0x3f4   : > { %v5442_v12 = vpop.f32.mrf.mxu1 }
 0x3f5   : > { %v2352_v63 = vsel %vm2288_vm13, %v5442_v12, -inf }
 0x3f6   : > { %v5450_v20 = vpop.f32.mrf.mxu1  ;;  %v2354_v41 = vmax.f32 %v2352_v63, %v2353_v28  ;;  %v2321_v28 = vsel %vm2288_vm13, %v5371_v37, -inf  ;;  %v2338_v63 = vsel %vm2288_vm13, %v5414_v49, -inf }
 0x3f7   : > { %v2357_v48 = vsel %vm2288_vm13, %v5450_v20, -inf  ;;  %v2322_v13 = vmax.f32 %v2320_v18, %v2321_v28 }
 0x3f8   : > { %v5464_v21 = vpop.f32.mrf.mxu1 }
 0x3f9   : > { %v2355_v32 = vsel %vm2288_vm13, %v5464_v21, -inf  ;;  %v2324_v54 = vmax.f32 %v2322_v13, %v2323_v55 }
 0x3fa   : > { %v5478_v8 = vpop.f32.mrf.mxu1  ;;  %v2356_v27 = vmax.f32 %v2354_v41, %v2355_v32  ;;  %v2339_v41 = vmax.f32 %v2337_v15, %v2338_v63  ;;  %v2305_v15 = vmax.f32 %v2303_v59, %v2304_v19 }
 0x3fb   : > { %v2361_v28 = vsel %vm2288_vm13, %v5478_v8, -inf  ;;  %v2325_v52 = vrot.slane %v2324_v54, 4 }
 0x3fc   : > { %v5492_v23 = vpop.f32.mrf.mxu1  ;;  %v2358_v32 = vmax.f32 %v2356_v27, %v2357_v48  ;;  %v2341_v26 = vmax.f32 %v2339_v41, %v2340_v31  ;;  %v5508_v48 = vpop.f32.mrf.mxu0  ;;  %v2342_v27 = vsel %vm2288_vm13, %v5422_v33, -inf  ;;  %v2306_v55 = vrot.slane %v2305_v15, 2 }
 0x3fd   : > { %v2359_v14 = vsel %vm2288_vm13, %v5492_v23, -inf  ;;  %5997 = vst [vmem:[#allocation36_spill] sm:$0xff] %v5508_v48  ;;  %v2344_v41 = vsel %vm2288_vm13, %v5418_v44, -inf  ;;  %v2326_v31 = vmax.f32 %v2324_v54, %v2325_v52 }
 0x3fe   : > { %v5500_v58 = vpop.f32.mrf.mxu1  ;;  %v2360_v62 = vmax.f32 %v2358_v32, %v2359_v14  ;;  %v2343_v50 = vmax.f32 %v2341_v26, %v2342_v27  ;;  %v5518_v32 = vpop.f32.mrf.mxu0  ;;  %v2307_v19 = vmax.f32 %v2305_v15, %v2306_v55 }
 0x3ff   : > { %5998 = vst [vmem:[#allocation37_spill] sm:$0xff] %v5518_v32  ;;  %v2327_v27 = vrot.slane %v2326_v31, 2 }
 0x400   : > { %v5512_v18 = vpop.f32.mrf.mxu1  ;;  %v2362_v63 = vmax.f32 %v2360_v62, %v2361_v28  ;;  %v5520_v13 = vpop.f32.mrf.mxu0  ;;  %v2345_v59 = vmax.f32 %v2343_v50, %v2344_v41  ;;  %v2365_v62 = vsel %vm2288_vm13, %v5500_v58, -inf  ;;  %v2308_v32 = vrot.slane %v2307_v19, 1 }
 0x401   : > { %v2363_v42 = vsel %vm2288_vm13, %v5512_v18, -inf  ;;  %5999 = vst [vmem:[#allocation38_spill] sm:$0xff] %v5520_v13  ;;  %v2328_v13 = vmax.f32 %v2326_v31, %v2327_v27 }
 0x402   : > { %v2364_v14 = vmax.f32 %v2362_v63, %v2363_v42  ;;  %v5526_v28 = vpop.f32.mrf.mxu0  ;;  %v2346_v48 = vrot.slane %v2345_v59, 4  ;;  %v2309_v42 = vmax.f32 %v2307_v19, %v2308_v32 }
 0x403   : > { %6000 = vst [vmem:[#allocation39_spill] sm:$0xff] %v5526_v28  ;;  %v2329_v52 = vrot.slane %v2328_v13, 1 }
 0x404   : > { %v2366_v26 = vmax.f32 %v2364_v14, %v2365_v62  ;;  %v5528_v17 = vpop.f32.mrf.mxu0  ;;  %v2347_v1 = vmax.f32 %v2345_v59, %v2346_v48 }
 0x405   : > { %6001 = vst [vmem:[#allocation40_spill] sm:$0xff] %v5528_v17  ;;  %v2330_v62 = vmax.f32 %v2328_v13, %v2329_v52 }
 0x406   : > { %v2367_v53 = vrot.slane %v2366_v26, 4  ;;  %v5530_v61 = vpop.f32.mrf.mxu0  ;;  %v2348_v15 = vrot.slane %v2347_v1, 2 }
 0x407   : > { %6002 = vst [vmem:[#allocation41_spill] sm:$0xff] %v5530_v61 }
 0x408   : > { %v2368_v54 = vmax.f32 %v2366_v26, %v2367_v53  ;;  %v2349_v17 = vmax.f32 %v2347_v1, %v2348_v15 }
 0x40a   : > { %v2369_v14 = vrot.slane %v2368_v54, 2  ;;  %v2350_v53 = vrot.slane %v2349_v17, 1 }
 0x40c   : > { %v2370_v32 = vmax.f32 %v2368_v54, %v2369_v14  ;;  %v2351_v54 = vmax.f32 %v2349_v17, %v2350_v53 }
 0x40e   : > { %v2371_v52 = vrot.slane %v2370_v32, 1 }
 0x410   : > { %v2372_v28 = vmax.f32 %v2370_v32, %v2371_v52 }
 0x46e   : > { %v5532_v50 = vpop.f32.mrf.mxu0 }
 0x46f   : > { %v5535_v63 = vmax.f32 %v2309_v42, %v5532_v50  ;;  %v2374_v41 = vrot.slane %v5532_v50, 1  ;;  %v2375_v42 = vrot.slane %v5532_v50, 2 }
 0x470   : > { %v4003_v55 = vpop.f32.mrf.mxu0 }
 0x471   : > { %v2388_v48 = vrot.slane %v5535_v63, %v5282_v51  ;;  %v5540_v31 = vmax.f32 %v2330_v62, %v2374_v41  ;;  %v2376_v55 = vrot.slane %v5532_v50, 3  ;;  %v5554_v62 = vmax.f32 %v2351_v54, %v2375_v42 }
 0x473   : > { %v2401_v59 = vsub.f32 %v5325_v56, %v2388_v48  ;;  %v2402_v19 = vsub.f32 %v5323_v22, %v2388_v48  ;;  %v2403_v26 = vsub.f32 %v5329_v3, %v2388_v48  ;;  %v2404_v27 = vsub.f32 %v5327_v60, %v2388_v48 }
 0x474   : > { %v2392_v1 = vrot.slane %v5540_v31, %v5282_v51  ;;  %v2405_v13 = vsub.f32 %v5333_v57, %v2388_v48  ;;  %v2406_v15 = vsub.f32 %v5331_v4, %v2388_v48  ;;  %v2407_v56 = vsub.f32 %v5339_v34, %v2388_v48 }
 0x475   : > { %v2433_v22 = vmul.f32 1.442695, %v2401_v59  ;;  %v2408_v3 = vsub.f32 %v5335_v30, %v2388_v48  ;;  %v2435_v41 = vmul.f32 1.442695, %v2402_v19  ;;  %v2437_v60 = vmul.f32 1.442695, %v2403_v26 }
 0x476   : > { %v2439_v14 = vmul.f32 1.442695, %v2404_v27  ;;  %v2409_v61 = vsub.f32 %v5347_v0, %v2392_v1  ;;  %v2441_v57 = vmul.f32 1.442695, %v2405_v13  ;;  %v2410_v4 = vsub.f32 %v5343_v7, %v2392_v1 }
 0x477   : > { %4183 = vpow2.f32 %v2433_v22  ;;  %v2443_v17 = vmul.f32 1.442695, %v2406_v15  ;;  %v2411_v53 = vsub.f32 %v5355_v5, %v2392_v1  ;;  %v2445_v34 = vmul.f32 1.442695, %v2407_v56 }
 0x478   : > { %4185 = vpow2.f32 %v2435_v41  ;;  %v5559_v59 = vmax.f32 %v2372_v28, %v2376_v55  ;;  %v2412_v30 = vsub.f32 %v5351_v2, %v2392_v1  ;;  %v2447_v48 = vmul.f32 1.442695, %v2408_v3 }
 0x479   : > { %4187 = vpow2.f32 %v2437_v60  ;;  %v5564_v0 = vrot.slane %v5554_v62, %v5282_v51  ;;  %v2413_v32 = vsub.f32 %v5363_v24, %v2392_v1  ;;  %v2449_v7 = vmul.f32 1.442695, %v2409_v61 }
 0x47a   : > { %4189 = vpow2.f32 %v2439_v14  ;;  %v2414_v19 = vsub.f32 %v5359_v16, %v2392_v1  ;;  %v2451_v5 = vmul.f32 1.442695, %v2410_v4  ;;  %v2415_v26 = vsub.f32 %v5371_v37, %v2392_v1 }
 0x47b   : > { %4191 = vpow2.f32 %v2441_v57  ;;  %v2453_v28 = vmul.f32 1.442695, %v2411_v53  ;;  %v2416_v2 = vsub.f32 %v5367_v29, %v2392_v1  ;;  %v2455_v27 = vmul.f32 1.442695, %v2412_v30 }
 0x47c   : > { %4193 = vpow2.f32 %v2443_v17  ;;  %v5572_v42 = vrot.slane %v5559_v59, %v5282_v51  ;;  %v2417_v24 = vsub.f32 %v5396_v43, %v5564_v0  ;;  %v2457_v61 = vmul.f32 1.442695, %v2413_v32 }
 0x47d   : > { %4195 = vpow2.f32 %v2445_v34  ;;  %v2418_v16 = vsub.f32 %v5390_v38, %v5564_v0  ;;  %v2419_v37 = vsub.f32 %v5404_v46, %v5564_v0  ;;  %v2459_v13 = vmul.f32 1.442695, %v2414_v19 }
 0x47e   : > { %4197 = vpow2.f32 %v2447_v48  ;;  %v2420_v29 = vsub.f32 %v5400_v10, %v5564_v0  ;;  %v2421_v51 = vsub.f32 %v5414_v49, %v5564_v0  ;;  %v2461_v1 = vmul.f32 1.442695, %v2415_v26 }
 0x47f   : > { %4199 = vpow2.f32 %v2449_v7  ;;  %v2422_v43 = vsub.f32 %v5410_v47, %v5564_v0  ;;  %v2423_v52 = vsub.f32 %v5422_v33, %v5564_v0  ;;  %v2463_v38 = vmul.f32 1.442695, %v2416_v2 }
 0x480   : > { %4201 = vpow2.f32 %v2451_v5  ;;  %v2424_v46 = vsub.f32 %v5418_v44, %v5564_v0  ;;  %v2425_v15 = vsub.f32 %v5442_v12, %v5572_v42  ;;  %v2465_v10 = vmul.f32 1.442695, %v2417_v24 }
 0x481   : > { %4203 = vpow2.f32 %v2453_v28  ;;  %v2426_v49 = vsub.f32 %v5428_v36, %v5572_v42  ;;  %v2427_v47 = vsub.f32 %v5464_v21, %v5572_v42  ;;  %v2467_v55 = vmul.f32 1.442695, %v2418_v16 }
 0x482   : > { %4205 = vpow2.f32 %v2455_v27  ;;  %v2429_v56 = vsub.f32 %v5492_v23, %v5572_v42  ;;  %v2469_v44 = vmul.f32 1.442695, %v2419_v37  ;;  %v2471_v3 = vmul.f32 1.442695, %v2420_v29 }
 0x483   : > { %4207 = vpow2.f32 %v2457_v61  ;;  %v2501_v36 = vrot.slane %v5540_v31, 7  ;;  %v2430_v60 = vsub.f32 %v5478_v8, %v5572_v42  ;;  %v2473_v23 = vmul.f32 1.442695, %v2421_v51 }
 0x484   : > { %v4184_v54 = vpop.eup %4183  ;;  %4209 = vpow2.f32 %v2459_v13  ;;  %v2431_v4 = vsub.f32 %v5512_v18, %v5572_v42  ;;  %v2475_v17 = vmul.f32 1.442695, %v2422_v43  ;;  %v2477_v34 = vmul.f32 1.442695, %v2423_v52 }
 0x485   : > { %v4186_v33 = vpop.eup %4185  ;;  %4211 = vpow2.f32 %v2461_v1  ;;  %v2511_v22 = vsel %vm2288_vm13, %v4184_v54, 0.0  ;;  %4006 = vmatprep.mubr.msk.f32.mxu0 %vm2288_vm13, %v4184_v54  ;;  %v2503_v30 = vrot.slane %v5554_v62, 6  ;;  %v2479_v0 = vmul.f32 1.442695, %v2424_v46 }
 0x486   : > { %v4188_v12 = vpop.eup %4187  ;;  %4213 = vpow2.f32 %v2463_v38  ;;  %v2512_v41 = vsel %vm2288_vm13, %v4186_v33, 0.0  ;;  %4007 = vmatmul.mubr.msk.f32.vlgmr.msra.gmra.mxu0 %vm2288_vm13, %v4186_v33  ;;  %v2502_v32 = vsel %vm993_vm8, %v2501_v36, %v5535_v63  ;;  %v2432_v19 = vsub.f32 %v5500_v58, %v5572_v42 }
 0x487   : > { %v4190_v21 = vpop.eup %4189  ;;  %4215 = vpow2.f32 %v2465_v10  ;;  %v2513_v14 = vadd.f32 %v2512_v41, %v2511_v22  ;;  %4009 = vmatprep.mubr.msk.f32.mxu0 %vm2288_vm13, %v4188_v12  ;;  %v2514_v31 = vsel %vm2288_vm13, %v4188_v12, 0.0  ;;  %v2481_v5 = vmul.f32 1.442695, %v2425_v15 }
 0x488   : > { %v4192_v57 = vpop.eup %4191  ;;  %4217 = vpow2.f32 %v2467_v55  ;;  %v2516_v7 = vsel %vm2288_vm13, %v4190_v21, 0.0  ;;  %v2483_v28 = vmul.f32 1.442695, %v2426_v49  ;;  %v2485_v2 = vmul.f32 1.442695, %v2427_v47 }
 0x489   : > { %v4194_v53 = vpop.eup %4193  ;;  %4219 = vpow2.f32 %v2469_v44  ;;  %v2515_v48 = vadd.f32 %v2514_v31, %v2513_v14  ;;  %v2489_v27 = vmul.f32 1.442695, %v2429_v56  ;;  %v2504_v24 = vsel %vm995_vm9, %v2503_v30, %v2502_v32 }
 0x48a   : > { %v4196_v8 = vpop.eup %4195  ;;  %4221 = vpow2.f32 %v2471_v3  ;;  %4010 = vmatmul.mubr.msk.f32.gmra.mxu0 %vm2288_vm13, %v4190_v21  ;;  %v2518_v61 = vsel %vm2288_vm13, %v4192_v57, 0.0  ;;  %v2505_v58 = vrot.slane %v5559_v59, 5  ;;  %v2428_v1 = vsub.f32 %v5450_v20, %v5572_v42 }
 0x48b   : > { %v5614_v18 = vpop.eup %4197  ;;  %4223 = vpow2.f32 %v2473_v23  ;;  %4012 = vmatprep.mubr.msk.f32.mxu0 %vm2288_vm13, %v4192_v57  ;;  %v2517_v62 = vadd.f32 %v2516_v7, %v2515_v48  ;;  %v2491_v43 = vmul.f32 1.442695, %v2430_v60  ;;  %v2493_v46 = vmul.f32 1.442695, %v2431_v4 }
 0x48c   : > { %v4200_v26 = vpop.eup %4199  ;;  %4225 = vpow2.f32 %v2475_v17  ;;  %v2506_v15 = vsel %vm997_vm10, %v2505_v58, %v2504_v24  ;;  %v2520_v54 = vsel %vm2288_vm13, %v4194_v53, 0.0  ;;  %v2495_v20 = vmul.f32 1.442695, %v2432_v19 }
 0x48d   : > { %v4202_v63 = vpop.eup %4201  ;;  %4227 = vpow2.f32 %v2477_v34  ;;  %v2532_v16 = vsel %vm2288_vm13, %v4200_v26, 0.0  ;;  %v2519_v13 = vadd.f32 %v2518_v61, %v2517_v62  ;;  %v2487_v56 = vmul.f32 1.442695, %v2428_v1 }
 0x48e   : > { %v4204_v37 = vpop.eup %4203  ;;  %4229 = vpow2.f32 %v2479_v0  ;;  %4013 = vmatmul.mubr.msk.f32.gmra.mxu0 %vm2288_vm13, %v4194_v53  ;;  %v2533_v29 = vsel %vm2288_vm13, %v4202_v63, 0.0  ;;  %v2508_v44 = vsub.f32 %v5532_v50, %v2506_v15  ;;  %v2522_v41 = vsel %vm2288_vm13, %v4196_v8, 0.0 }
 0x48f   : > { %v4206_v51 = vpop.eup %4205  ;;  %4231 = vpow2.f32 %v2481_v5  ;;  %4015 = vmatprep.mubr.msk.f32.mxu0 %vm2288_vm13, %v4196_v8  ;;  %v2534_v52 = vadd.f32 %v2533_v29, %v2532_v16  ;;  %v2535_v59 = vsel %vm2288_vm13, %v4204_v37, 0.0  ;;  %v2521_v42 = vadd.f32 %v2520_v54, %v2519_v13 }
 0x490   : > { %v4208_v38 = vpop.eup %4207  ;;  %4233 = vpow2.f32 %v2483_v28  ;;  %v2537_v55 = vsel %vm2288_vm13, %v4206_v51, 0.0  ;;  %v2509_v17 = vmul.f32 1.442695, %v2508_v44  ;;  %v2524_v0 = vsel %vm2288_vm13, %v5614_v18, 0.0 }
 0x491   : > { %v4210_v10 = vpop.eup %4209  ;;  %4235 = vpow2.f32 %v2485_v2  ;;  %v2536_v49 = vadd.f32 %v2535_v59, %v2534_v52  ;;  %v2539_v3 = vsel %vm2288_vm13, %v4208_v38, 0.0  ;;  %v2523_v50 = vadd.f32 %v2522_v41, %v2521_v42 }
 0x492   : > { %v4212_v47 = vpop.eup %4211  ;;  %4237 = vpow2.f32 %v2489_v27  ;;  %4016 = vmatmul.mubr.msk.f32.gmra.mxu0 %vm2288_vm13, %v5614_v18  ;;  %v2541_v14 = vsel %vm2288_vm13, %v4210_v10, 0.0 }
 0x493   : > { %v5634_v33 = vpop.eup %4213  ;;  %4239 = vpow2.f32 %v2491_v43  ;;  %4018 = vmatprep.mubr.msk.f32.mxu0 %vm2288_vm13, %v4200_v26  ;;  %v2538_v22 = vadd.f32 %v2537_v55, %v2536_v49  ;;  %v2543_v30 = vsel %vm2288_vm13, %v4212_v47, 0.0  ;;  %v2525_v5 = vadd.f32 %v2524_v0, %v2523_v50 }
 0x494   : > { %v5638_v12 = vpop.eup %4215  ;;  %4241 = vpow2.f32 %v2493_v46  ;;  %v2545_v62 = vsel %vm2288_vm13, %v5634_v33, 0.0 }
 0x495   : > { %v5641_v36 = vpop.eup %4217  ;;  %v2540_v21 = vadd.f32 %v2539_v3, %v2538_v22  ;;  %v2553_v60 = vsel %vm2288_vm13, %v5638_v12, 0.0  ;;  %4243 = vpow2.f32 %v2495_v20  ;;  %v2526_v13 = vrot.slane %v2525_v5, 4 }
 0x496   : > { %v5646_v23 = vpop.eup %4219  ;;  %4019 = vmatmul.mubr.msk.f32.gmra.mxu0 %vm2288_vm13, %v4202_v63  ;;  %v2554_v57 = vsel %vm2288_vm13, %v5641_v36, 0.0  ;;  %4245 = vpow2.f32 %v2487_v56  ;;  %v6003_v56 = vmov 0.0  }
 0x497   : > { %v5652_v4 = vpop.eup %4221  ;;  %4021 = vmatprep.mubr.msk.f32.mxu0 %vm2288_vm13, %v4204_v37  ;;  %v2542_v31 = vadd.f32 %v2541_v14, %v2540_v21  ;;  %v2555_v53 = vadd.f32 %v2554_v57, %v2553_v60  ;;  %v2556_v48 = vsel %vm2288_vm13, %v5646_v23, 0.0  ;;  %4247 = vpow2.f32 %v2509_v17 }
 0x498   : > { %v5655_v34 = vpop.eup %4223  ;;  %v2558_v26 = vsel %vm2288_vm13, %v5652_v4, 0.0 }
 0x499   : > { %v5660_v8 = vpop.eup %4225  ;;  %v2544_v32 = vadd.f32 %v2543_v30, %v2542_v31  ;;  %v2557_v7 = vadd.f32 %v2556_v48, %v2555_v53  ;;  %v2560_v63 = vsel %vm2288_vm13, %v5655_v34, 0.0 }
 0x49a   : > { %v5664_v19 = vpop.eup %4227  ;;  %4022 = vmatmul.mubr.msk.f32.gmra.mxu0 %vm2288_vm13, %v4206_v51  ;;  %v2562_v29 = vsel %vm2288_vm13, %v5660_v8, 0.0 }
 0x49b   : > { %v5671_v28 = vpop.eup %4229  ;;  %4024 = vmatprep.mubr.msk.f32.mxu0 %vm2288_vm13, %v4208_v38  ;;  %v2546_v2 = vadd.f32 %v2545_v62, %v2544_v32  ;;  %v2559_v18 = vadd.f32 %v2558_v26, %v2557_v7  ;;  %v2564_v15 = vsel %vm2288_vm13, %v5664_v19, 0.0 }
 0x49c   : > { %v5674_v27 = vpop.eup %4231  ;;  %v2566_v20 = vsel %vm2288_vm13, %v5671_v28, 0.0 }
 0x49d   : > { %v5678_v24 = vpop.eup %4233  ;;  %v2547_v61 = vrot.slane %v2546_v2, 4  ;;  %v2561_v16 = vadd.f32 %v2560_v63, %v2559_v18  ;;  %v2574_v37 = vsel %vm2288_vm13, %v5674_v27, 0.0 }
 0x49e   : > { %v5682_v58 = vpop.eup %4235  ;;  %4025 = vmatmul.mubr.msk.f32.gmra.mxu0 %vm2288_vm13, %v4210_v10  ;;  %v2575_v51 = vsel %vm2288_vm13, %v5678_v24, 0.0 }
 0x49f   : > { %v4238_v1 = vpop.eup %4237  ;;  %4027 = vmatprep.mubr.msk.f32.mxu0 %vm2288_vm13, %v4212_v47  ;;  %v2548_v43 = vadd.f32 %v2547_v61, %v2546_v2  ;;  %v2563_v52 = vadd.f32 %v2562_v29, %v2561_v16  ;;  %v2576_v38 = vadd.f32 %v2575_v51, %v2574_v37  ;;  %v2577_v49 = vsel %vm2288_vm13, %v5682_v58, 0.0 }
 0x4a0   : > { %v4240_v46 = vpop.eup %4239  ;;  %4048 = vmatprep.mubr.msk.f32.mxu1 %vm2288_vm13, %v4238_v1  ;;  %v2527_v47 = vadd.f32 %v2526_v13, %v2525_v5  ;;  %v2581_v14 = vsel %vm2288_vm13, %v4238_v1, 0.0 }
 0x4a1   : > { %v4242_v59 = vpop.eup %4241  ;;  %4049 = vmatmul.mubr.msk.f32.vlgmr.msra.gmra.mxu1 %vm2288_vm13, %v4240_v46  ;;  %v2549_v10 = vrot.slane %v2548_v43, 2  ;;  %v2565_v54 = vadd.f32 %v2564_v15, %v2563_v52  ;;  %v2578_v42 = vadd.f32 %v2577_v49, %v2576_v38  ;;  %v2583_v53 = vsel %vm2288_vm13, %v4240_v46, 0.0  ;;  %v3240_v49 = vld [vmem:[#allocation10 + $0x28] sm:$0xff] }
 0x4a2   : > { %4051 = vmatprep.mubr.msk.f32.mxu1 %vm2288_vm13, %v4242_v59  ;;  %4055 = vmatpush3.msk.msra.mxu1 %vm2711_vm12, %v5376_v40  ;;  %v4244_v55 = vpop.eup %4243  ;;  %v2528_v60 = vrot.slane %v2527_v47, 2 }
 0x4a3   : > { %4028 = vmatmul.mubr.msk.f32.gmra.mxu0 %vm2288_vm13, %v5634_v33  ;;  %4059 = vmatprep.subr.mxu1 %v6003_v56  ;;  %v2567_v44 = vadd.f32 %v2566_v20, %v2565_v54  ;;  %v4246_v22 = vpop.eup %4245  ;;  %v2550_v3 = vadd.f32 %v2549_v10, %v2548_v43  ;;  %v2587_v5 = vsel %vm2288_vm13, %v4244_v55, 0.0  ;;  %v3242_v10 = vld [vmem:[#allocation10 + $0x38] sm:$0xff]  ;;  %v3241_v54 = vld [vmem:[#allocation10 + $0x30] sm:$0xff] }
 0x4a4   : > { %4030 = vmatprep.mubr.msk.f32.mxu0 %vm2288_vm13, %v5638_v12  ;;  %v2579_v21 = vsel %vm2288_vm13, %v4246_v22, 0.0  ;;  %v4248_v57 = vpop.eup %4247  ;;  %4065 = vmatpush3.msra.mxu0 %v3242_v10  ;;  %v3238_v20 = vld [vmem:[#allocation10 + $0x18] sm:$0xff] }
 0x4a5   : > { %4052 = vmatmul.mubr.msk.f32.gmra.mxu1 %vm2288_vm13, %v4244_v55  ;;  %v2568_v41 = vrot.slane %v2567_v44, 4  ;;  %v2580_v50 = vadd.f32 %v2579_v21, %v2578_v42  ;;  %v2551_v12 = vrot.slane %v2550_v3, 1  ;;  %v2596_v26 = vrot.slane %v4248_v57, 1  ;;  %4066 = vmatprep.subr.mxu0 %v6003_v56  ;;  %v3237_v42 = vld [vmem:[#allocation10 + $0x10] sm:$0xff]  ;;  %v3236_v55 = vld [vmem:[#allocation10 + $0x8] sm:$0xff]  ;;  %v6010_v10 = vld [vmem:[#allocation26_spill] sm:$0xff] }
 0x4a6   : > { %4056 = vmatprep.mubr.msk.f32.mxu1 %vm4474_vm11, %v6003_v56  ;;  %v2597_v63 = vrot.slane %v4248_v57, 2  ;;  %v2598_v51 = vrot.slane %v4248_v57, 3  ;;  %4067 = vmatpush3.msra.mxu0 %v3241_v54 }
 0x4a7   : > { %4031 = vmatmul.mubr.msk.f32.gmra.mxu0 %vm2288_vm13, %v5641_v36  ;;  %v2569_v33 = vadd.f32 %v2568_v41, %v2567_v44  ;;  %v2582_v17 = vadd.f32 %v2581_v14, %v2580_v50  ;;  %v2529_v36 = vadd.f32 %v2528_v60, %v2527_v47  ;;  %v2552_v0 = vadd.f32 %v2551_v12, %v2550_v3  ;;  %v3239_v47 = vld [vmem:[#allocation10 + $0x20] sm:$0xff] }
 0x4a8   : > { %4033 = vmatprep.mubr.msk.f32.mxu0 %vm2288_vm13, %v5646_v23  ;;  %v2585_v23 = vsel %vm2288_vm13, %v4242_v59, 0.0  ;;  %4068 = vmatprep.subr.mxu0 %v6003_v56  ;;  %v3235_v44 = vld [vmem:[#allocation10] sm:$0xff] }
 0x4a9   : > { %4057 = vmatmul.mubr.msk.f32.vlgmr.msra.gmra.mxu1 %vm2288_vm13, %v4248_v57  ;;  %v2570_v31 = vrot.slane %v2569_v33, 2  ;;  %v2584_v30 = vadd.f32 %v2583_v53, %v2582_v17  ;;  %v2604_v18 = vadd.f32 %v2596_v26, %v2552_v0  ;;  %4069 = vmatpush3.msra.mxu0 %v3240_v49 }
 0x4aa   : > { %4060 = vmatpush3.msk.msra.mxu1 %vm2711_vm12, %v5376_v40  ;;  %4061 = vmatprep.mubr.msk.f32.mxu1 %vm4474_vm11, %v6003_v56  ;;  %v2530_v40 = vrot.slane %v2529_v36, 1 }
 0x4ab   : > { %4034 = vmatmul.mubr.msk.f32.gmra.mxu0 %vm2288_vm13, %v5652_v4  ;;  %v2571_v48 = vadd.f32 %v2570_v31, %v2569_v33  ;;  %v2586_v32 = vadd.f32 %v2585_v23, %v2584_v30  ;;  %4249 = vrcp.f32 %v2604_v18  ;;  %4070 = vmatprep.subr.mxu0 %v6003_v56 }
 0x4ac   : > { %4036 = vmatprep.mubr.msk.f32.mxu0 %vm2288_vm13, %v5655_v34  ;;  %v2531_v61 = vadd.f32 %v2530_v40, %v2529_v36  ;;  %4071 = vmatpush3.msra.mxu0 %v3239_v47 }
 0x4ad   : > { %v2572_v7 = vrot.slane %v2571_v48, 1  ;;  %v2588_v62 = vadd.f32 %v2587_v5, %v2586_v32  ;;  %4072 = vmatprep.subr.mxu0 %v6003_v56 }
 0x4ae   : > { %4073 = vmatpush3.msra.mxu0 %v3238_v20 }
 0x4af   : > { %4037 = vmatmul.mubr.msk.f32.gmra.mxu0 %vm2288_vm13, %v5660_v8  ;;  %v2573_v2 = vadd.f32 %v2572_v7, %v2571_v48  ;;  %v2589_v4 = vrot.slane %v2588_v62, 4  ;;  %v2603_v8 = vadd.f32 %v4248_v57, %v2531_v61  ;;  %4074 = vmatprep.subr.mxu0 %v6003_v56 }
 0x4b0   : > { %4039 = vmatprep.mubr.msk.f32.mxu0 %vm2288_vm13, %v5664_v19  ;;  %4075 = vmatpush3.msra.mxu0 %v3237_v42 }
 0x4b1   : > { %v2590_v34 = vadd.f32 %v2589_v4, %v2588_v62  ;;  %v2605_v16 = vadd.f32 %v2597_v63, %v2573_v2  ;;  %4076 = vmatprep.subr.mxu0 %v6003_v56  ;;  %v6004_v2 = vld [vmem:[#allocation21_spill] sm:$0xff] }
 0x4b2   : > { %4077 = vmatpush3.msra.mxu0 %v3236_v55 }
 0x4b3   : > { %4040 = vmatmul.mubr.msk.f32.gmra.mxu0 %vm2288_vm13, %v5671_v28  ;;  %v2591_v37 = vrot.slane %v2590_v34, 2  ;;  %4251 = vrcp.f32 %v2605_v16  ;;  %4078 = vmatprep.subr.mxu0 %v6003_v56 }
 0x4b4   : > { %4042 = vmatprep.mubr.msk.f32.mxu0 %vm2288_vm13, %v5674_v27  ;;  %4253 = vrcp.f32 %v2603_v8  ;;  %4079 = vmatpush3.msra.mxu0 %v3235_v44 }
 0x4b5   : > { %v2592_v13 = vadd.f32 %v2591_v37, %v2590_v34 }
 0x4b7   : > { %4043 = vmatmul.mubr.msk.f32.gmra.mxu0 %vm2288_vm13, %v5678_v24  ;;  %v2593_v19 = vrot.slane %v2592_v13, 1 }
 0x4b8   : > { %4045 = vmatprep.mubr.msk.f32.mxu0 %vm2288_vm13, %v5682_v58  ;;  %v4250_v27 = vpop.eup %4249 }
 0x4b9   : > { %v2594_v29 = vadd.f32 %v2593_v19, %v2592_v13  ;;  %v3145_v43 = vrot.slane %v4250_v27, 7  ;;  %v6005_v19 = vld [vmem:[#allocation25_spill] sm:$0xff] }
 0x4bb   : > { %4046 = vmatmul.mubr.msk.f32.gmra.mxu0 %vm2288_vm13, %v4246_v22  ;;  %v2606_v28 = vadd.f32 %v2598_v51, %v2594_v29  ;;  %v6006_v51 = vld [vmem:[#allocation22_spill] sm:$0xff] }
 0x4bc   : > { %4080 = vmatprep.mubr.msk.f32.mxu0 %vm4474_vm11, %v6003_v56 }
 0x4bd   : > { %4255 = vrcp.f32 %v2606_v28 }
 0x4c0   : > { %v4252_v1 = vpop.eup %4251 }
 0x4c1   : > { %v4254_v52 = vpop.eup %4253  ;;  %v3147_v24 = vrot.slane %v4252_v1, 6  ;;  %v6007_v1 = vld [vmem:[#allocation17_spill] sm:$0xff] }
 0x4c2   : > { %v3146_v38 = vsel %vm993_vm8, %v3145_v43, %v4254_v52 }
 0x4c3   : > { %v3148_v58 = vsel %vm995_vm9, %v3147_v24, %v3146_v38 }
 0x4ca   : > { %v4256_v46 = vpop.eup %4255 }
 0x4cb   : > { %v3149_v15 = vrot.slane %v4256_v46, 5  ;;  %v6008_v46 = vld [vmem:[#allocation23_spill] sm:$0xff] }
 0x4cd   : > { %v3150_v59 = vsel %vm997_vm10, %v3149_v15, %v3148_v58  ;;  %v6009_v15 = vld [vmem:[#allocation27_spill] sm:$0xff] }
 0x4ce   : > { %4062 = vmatmul.mubr.msk.f32.vlgmr.msra.gmra.mxu1 %vm2288_vm13, %v3150_v59 }
 0x546   : > { %v4008_v22 = vpop.f32.mrf.mxu0 }
 0x547   : > { %v2941_v62 = vmul.f32 %v4008_v22, %v5341_v35 }
 0x548   : > { %v2781_v3 = vpop.f32.mrf.mxu0 }
 0x549   : > { %v2940_v7 = vmul.f32 %v2781_v3, %v5345_v11  ;;  %v2973_v16 = vsel %vm470_vm0, %v2941_v62, 0.0 }
 0x54a   : > { %v4011_v41 = vpop.f32.mrf.mxu0 }
 0x54b   : > { %v2972_v63 = vsel %vm470_vm0, %v2940_v7, 0.0  ;;  %v2943_v29 = vmul.f32 %v4011_v41, %v6005_v19 }
 0x54c   : > { %v2791_v21 = vpop.f32.mrf.mxu0 }
 0x54d   : > { %v2942_v26 = vmul.f32 %v2791_v21, %v5353_v9  ;;  %v2974_v9 = vadd.f32 %v2973_v16, %v2972_v63  ;;  %v2977_v20 = vsel %vm470_vm0, %v2943_v29, 0.0  ;;  %v6017_v63 = vld [vmem:[#allocation30_spill] sm:$0xff]  ;;  %v6018_v29 = vld [vmem:[#allocation32_spill] sm:$0xff] }
 0x54e   : > { %v4014_v60 = vpop.f32.mrf.mxu0 }
 0x54f   : > { %v2975_v37 = vsel %vm470_vm0, %v2942_v26, 0.0 }
 0x550   : > { %v2801_v50 = vpop.f32.mrf.mxu0  ;;  %v2976_v27 = vadd.f32 %v2975_v37, %v2974_v9 }
 0x551   : > { %v2944_v43 = vmul.f32 %v2801_v50, %v6007_v1 }
 0x552   : > { %v5753_v33 = vpop.f32.mrf.mxu0  ;;  %v2978_v44 = vadd.f32 %v2977_v20, %v2976_v27  ;;  %v6022_v20 = vld [vmem:[#allocation35_spill] sm:$0xff] }
 0x553   : > { %v2979_v22 = vsel %vm470_vm0, %v2944_v43, 0.0 }
 0x554   : > { %v5755_v14 = vpop.f32.mrf.mxu0 }
 0x556   : > { %v4020_v57 = vpop.f32.mrf.mxu0 }
 0x557   : > { %v2949_v31 = vmul.f32 %v4020_v57, %v5382_v45  ;;  %v6011_v57 = vld [vmem:[#allocation28_spill] sm:$0xff] }
 0x558   : > { %v2821_v12 = vpop.f32.mrf.mxu0 }
 0x559   : > { %v2948_v17 = vmul.f32 %v2821_v12, %v5392_v39  ;;  %v2994_v48 = vsel %vm470_vm0, %v2949_v31, 0.0 }
 0x55a   : > { %v4023_v53 = vpop.f32.mrf.mxu0 }
 0x55b   : > { %v2993_v56 = vsel %vm470_vm0, %v2948_v17, 0.0  ;;  %v2951_v5 = vmul.f32 %v4023_v53, %v5394_v25  ;;  %v6012_v17 = vld [vmem:[#allocation29_spill] sm:$0xff] }
 0x55c   : > { %v2831_v36 = vpop.f32.mrf.mxu0  ;;  %v2995_v0 = vadd.f32 %v2994_v48, %v2993_v56  ;;  %v6014_v48 = vld [vmem:[#allocation24_spill] sm:$0xff] }
 0x55d   : > { %v2950_v30 = vmul.f32 %v2831_v36, %v5398_v6  ;;  %v2998_v61 = vsel %vm470_vm0, %v2951_v5, 0.0  ;;  %v6013_v36 = vld [vmem:[#allocation18_spill] sm:$0xff] }
 0x55e   : > { %v4026_v23 = vpop.f32.mrf.mxu0 }
 0x55f   : > { %v2996_v32 = vsel %vm470_vm0, %v2950_v30, 0.0  ;;  %v2953_v28 = vmul.f32 %v4026_v23, %v6006_v51  ;;  %v2945_v30 = vmul.f32 %v4014_v60, %v6013_v36 }
 0x560   : > { %v2841_v40 = vpop.f32.mrf.mxu0  ;;  %v2997_v45 = vadd.f32 %v2996_v32, %v2995_v0  ;;  %v2980_v32 = vadd.f32 %v2979_v22, %v2978_v44 }
 0x561   : > { %v5765_v39 = vpop.f32.mrf.mxu1  ;;  %v2952_v6 = vmul.f32 %v2841_v40, %v6004_v2  ;;  %v3002_v42 = vsel %vm470_vm0, %v2953_v28, 0.0  ;;  %v6016_v2 = vld [vmem:[#allocation31_spill] sm:$0xff]  ;;  %v2981_v60 = vsel %vm470_vm0, %v2945_v30, 0.0  ;;  %v6019_v28 = vld [vmem:[#allocation33_spill] sm:$0xff] }
 0x562   : > { %v2999_v25 = vadd.f32 %v2998_v61, %v2997_v45  ;;  %v6015_v45 = vld [vmem:[#allocation19_spill] sm:$0xff]  ;;  %v2982_v37 = vadd.f32 %v2981_v60, %v2980_v32  ;;  %v6028_v60 = vld [vmem:[#allocation40_spill] sm:$0xff] }
 0x563   : > { %v5770_v4 = vpop.f32.mrf.mxu1  ;;  %v4029_v18 = vpop.f32.mrf.mxu0  ;;  %v3000_v35 = vsel %vm470_vm0, %v2952_v6, 0.0  ;;  %v2946_v62 = vmul.f32 %v5755_v14, %v6015_v45  ;;  %v6025_v30 = vld [vmem:[#allocation39_spill] sm:$0xff] }
 0x564   : > { %v3001_v24 = vadd.f32 %v3000_v35, %v2999_v25  ;;  %v2955_v23 = vmul.f32 %v4029_v18, %v6014_v48  ;;  %v2968_v48 = vmul.f32 %v5770_v4, %v6025_v30  ;;  %v3610_v30 = vld [vmem:[%s5896_s9] ss:$0 sm:$0xff] }
 0x565   : > { %v5774_v11 = vpop.f32.mrf.mxu1  ;;  %v2851_v34 = vpop.f32.mrf.mxu0  ;;  %v2983_v14 = vsel %vm470_vm0, %v2946_v62, 0.0 }
 0x566   : > { %v2954_v58 = vmul.f32 %v2851_v34, %v6008_v46  ;;  %v3003_v3 = vadd.f32 %v3002_v42, %v3001_v24  ;;  %v3006_v18 = vsel %vm470_vm0, %v2955_v23, 0.0  ;;  %v6020_v24 = vld [vmem:[#allocation20_spill] sm:$0xff] }
 0x567   : > { %v5779_v13 = vpop.f32.mrf.mxu1  ;;  %v4032_v8 = vpop.f32.mrf.mxu0 }
 0x568   : > { %v2957_v59 = vmul.f32 %v4032_v8, %v6009_v15  ;;  %v3004_v21 = vsel %vm470_vm0, %v2954_v58, 0.0  ;;  %v2984_v58 = vadd.f32 %v2983_v14, %v2982_v37 }
 0x569   : > { %v5784_v52 = vpop.f32.mrf.mxu1  ;;  %v2861_v38 = vpop.f32.mrf.mxu0  ;;  %v3005_v7 = vadd.f32 %v3004_v21, %v3003_v3 }
 0x56a   : > { %v2956_v54 = vmul.f32 %v2861_v38, %v6010_v10  ;;  %v3015_v50 = vsel %vm470_vm0, %v2957_v59, 0.0  ;;  %v2947_v38 = vmul.f32 %v5753_v33, %v6020_v24 }
 0x56b   : > { %v4058_v49 = vpop.f32.mrf.mxu1  ;;  %v4035_v47 = vpop.f32.mrf.mxu0  ;;  %v3007_v35 = vadd.f32 %v3006_v18, %v3005_v7  ;;  %v2971_v18 = vmul.f32 %v5774_v11, %v6028_v60 }
 0x56c   : > { %v3014_v55 = vsel %vm470_vm0, %v2956_v54, 0.0  ;;  %v2959_v12 = vmul.f32 %v4035_v47, %v6011_v57  ;;  %v6021_v49 = vld [vmem:[#allocation34_spill] sm:$0xff]  ;;  %v2985_v22 = vsel %vm470_vm0, %v2947_v38, 0.0 }
 0x56d   : > { %v2871_v41 = vpop.f32.mrf.mxu0  ;;  %v3016_v53 = vadd.f32 %v3015_v50, %v3014_v55  ;;  %v3008_v15 = vrot.slane %v3007_v35, 4  ;;  %v3048_v14 = vsel %vm470_vm0, %v2971_v18, 0.0 }
 0x56e   : > { %v2958_v31 = vmul.f32 %v2871_v41, %v6012_v17  ;;  %v3019_v26 = vsel %vm470_vm0, %v2959_v12, 0.0  ;;  %v2986_v41 = vadd.f32 %v2985_v22, %v2984_v58  ;;  %v6023_v12 = vld [vmem:[#allocation36_spill] sm:$0xff] }
 0x56f   : > { %v4038_v56 = vpop.f32.mrf.mxu0  ;;  %v3009_v33 = vadd.f32 %v3008_v15, %v3007_v35 }
 0x570   : > { %v3017_v0 = vsel %vm470_vm0, %v2958_v31, 0.0  ;;  %v2961_v6 = vmul.f32 %v4038_v56, %v6016_v2  ;;  %v6024_v31 = vld [vmem:[#allocation37_spill] sm:$0xff]  ;;  %v3042_v2 = vsel %vm470_vm0, %v2968_v48, 0.0 }
 0x571   : > { %v3018_v5 = vadd.f32 %v3017_v0, %v3016_v53  ;;  %v2881_v40 = vpop.f32.mrf.mxu0  ;;  %v2987_v0 = vrot.slane %v2986_v41, 4  ;;  %v3010_v32 = vrot.slane %v3009_v33, 2 }
 0x572   : > { %v2960_v61 = vmul.f32 %v2881_v40, %v6017_v63  ;;  %v3023_v19 = vsel %vm470_vm0, %v2961_v6, 0.0  ;;  %v6027_v6 = vld [vmem:[#allocation41_spill] sm:$0xff] }
 0x573   : > { %v3020_v25 = vadd.f32 %v3019_v26, %v3018_v5  ;;  %v4041_v34 = vpop.f32.mrf.mxu0  ;;  %v6026_v5 = vld [vmem:[#allocation38_spill] sm:$0xff]  ;;  %v2970_v63 = vmul.f32 %v5779_v13, %v6027_v6 }
 0x574   : > { %v3021_v16 = vsel %vm470_vm0, %v2960_v61, 0.0  ;;  %v2963_v51 = vmul.f32 %v4041_v34, %v6018_v29  ;;  %v2969_v40 = vmul.f32 %v5765_v39, %v6026_v5  ;;  %v2988_v61 = vadd.f32 %v2987_v0, %v2986_v41  ;;  %v6029_v29 = vld [vmem:[#allocation16_spill] sm:$0xff] }
 0x575   : > { %v3022_v9 = vadd.f32 %v3021_v16, %v3020_v25  ;;  %v2891_v8 = vpop.f32.mrf.mxu0  ;;  %v3011_v25 = vadd.f32 %v3010_v32, %v3009_v33  ;;  %v3046_v39 = vsel %vm470_vm0, %v2970_v63, 0.0  ;;  %v3128_v13 = vmul.f32 %v5784_v52, %v6029_v29 }
 0x576   : > { %v2962_v27 = vmul.f32 %v2891_v8, %v6019_v28  ;;  %v3027_v54 = vsel %vm470_vm0, %v2963_v51, 0.0  ;;  %v3044_v34 = vsel %vm470_vm0, %v2969_v40, 0.0  ;;  %v2989_v35 = vrot.slane %v2988_v61, 2 }
 0x577   : > { %v3024_v1 = vadd.f32 %v3023_v19, %v3022_v9  ;;  %v4044_v43 = vpop.f32.mrf.mxu0  ;;  %v3012_v9 = vrot.slane %v3011_v25, 1  ;;  %v3130_v24 = vrot.slane %v3128_v13, 1  ;;  %v3132_v22 = vrot.slane %v3128_v13, 3 }
 0x578   : > { %v3025_v46 = vsel %vm470_vm0, %v2962_v27, 0.0  ;;  %v2965_v47 = vmul.f32 %v4044_v43, %v6021_v49  ;;  %v2990_v28 = vadd.f32 %v2989_v35, %v2988_v61 }
 0x579   : > { %v3026_v59 = vadd.f32 %v3025_v46, %v3024_v1  ;;  %v2901_v10 = vpop.f32.mrf.mxu0  ;;  %v3013_v27 = vadd.f32 %v3012_v9, %v3011_v25  ;;  %v3131_v46 = vrot.slane %v3128_v13, 2 }
 0x57a   : > { %v2964_v42 = vmul.f32 %v2901_v10, %v6022_v20  ;;  %v3036_v57 = vsel %vm470_vm0, %v2965_v47, 0.0  ;;  %v2991_v58 = vrot.slane %v2990_v28, 1 }
 0x57b   : > { %v3028_v55 = vadd.f32 %v3027_v54, %v3026_v59  ;;  %v4047_v44 = vpop.f32.mrf.mxu0  ;;  %v3138_v15 = vadd.f32 %v3130_v24, %v3013_v27 }
 0x57c   : > { %v3035_v3 = vsel %vm470_vm0, %v2964_v42, 0.0  ;;  %v2967_v17 = vmul.f32 %v4047_v44, %v6023_v12  ;;  %v2992_v42 = vadd.f32 %v2991_v58, %v2990_v28 }
 0x57d   : > { %v3029_v21 = vrot.slane %v3028_v55, 4  ;;  %v2911_v50 = vpop.f32.mrf.mxu0  ;;  %v3037_v36 = vadd.f32 %v3036_v57, %v3035_v3 }
 0x57e   : > { %v2966_v53 = vmul.f32 %v2911_v50, %v6024_v31  ;;  %v3040_v62 = vsel %vm470_vm0, %v2967_v17, 0.0  ;;  %v3137_v41 = vadd.f32 %v3128_v13, %v2992_v42 }
 0x57f   : > { %v3030_v56 = vadd.f32 %v3029_v21, %v3028_v55 }
 0x580   : > { %v3038_v23 = vsel %vm470_vm0, %v2966_v53, 0.0 }
 0x581   : > { %v3039_v7 = vadd.f32 %v3038_v23, %v3037_v36  ;;  %v3031_v45 = vrot.slane %v3030_v56, 2 }
 0x583   : > { %v3041_v26 = vadd.f32 %v3040_v62, %v3039_v7  ;;  %v3032_v16 = vadd.f32 %v3031_v45, %v3030_v56 }
 0x585   : > { %v3043_v4 = vadd.f32 %v3042_v2, %v3041_v26  ;;  %v3033_v19 = vrot.slane %v3032_v16, 1 }
 0x587   : > { %v3045_v37 = vadd.f32 %v3044_v34, %v3043_v4  ;;  %v3034_v43 = vadd.f32 %v3033_v19, %v3032_v16 }
 0x589   : > { %v3047_v8 = vadd.f32 %v3046_v39, %v3045_v37  ;;  %v3139_v49 = vadd.f32 %v3131_v46, %v3034_v43 }
 0x58b   : > { %v3049_v51 = vadd.f32 %v3048_v14, %v3047_v8 }
 0x58d   : > { %v3050_v1 = vrot.slane %v3049_v51, 4 }
 0x58e   : > { %v3219_v11 = vpop.f32.mrf.mxu1 }
 0x58f   : > { %v3051_v38 = vadd.f32 %v3050_v1, %v3049_v51  ;;  %v3224_v59 = vrot.slane %v3219_v11, 1  ;;  %v3225_v20 = vrot.slane %v3219_v11, 2  ;;  %v3226_v33 = vrot.slane %v3219_v11, 3 }
 0x590   : > { %v4063_v10 = vpop.f32.mrf.mxu1  ;;  %v3231_v12 = vmul.f32 %v3219_v11, %v3137_v41 }
 0x591   : > { %v3052_v54 = vrot.slane %v3051_v38, 2  ;;  %v3232_v55 = vmul.f32 %v3224_v59, %v3138_v15  ;;  %v3233_v44 = vmul.f32 %v3225_v20, %v3139_v49 }
 0x593   : > { %v3053_v47 = vadd.f32 %v3052_v54, %v3051_v38  ;;  %v3254_v21 = vrot.slane %v3232_v55, 7  ;;  %v3256_v57 = vrot.slane %v3233_v44, 6 }
 0x595   : > { %v3054_v52 = vrot.slane %v3053_v47, 1  ;;  %v3255_v31 = vsel %vm993_vm8, %v3254_v21, %v3231_v12 }
 0x596   : > { %v3257_v56 = vsel %vm995_vm9, %v3256_v57, %v3255_v31 }
 0x597   : > { %v3055_v3 = vadd.f32 %v3054_v52, %v3053_v47 }
 0x599   : > { %v3140_v50 = vadd.f32 %v3132_v22, %v3055_v3 }
 0x59b   : > { %v3234_v17 = vmul.f32 %v3226_v33, %v3140_v50 }
 0x59d   : > { %v3258_v53 = vrot.slane %v3234_v17, 5 }
 0x59f   : > { %v3259_v36 = vsel %vm997_vm10, %v3258_v53, %v3257_v56 }
 0x5a0   : > { %4081 = vmatmul.mubr.msk.f32.vlgmr.msra.gmra.mxu0 %vm470_vm0, %v3259_v36 }
 0x660   : > { %v3328_v48 = vpop.f32.mrf.mxu0 }
 0x661   : > { %v3329_v23 = vadd.f32 %v3610_v30, %v3328_v48 }
 0x662   : > { %v4082_v0 = vpop.f32.mrf.mxu0 }
 0x663   : > { %3333 = vst.msk [vmem:[%s436_s23] sm:$0xf] %vm3332_vm14, %v3329_v23 }
 0x664   : > { %4402 = shalt.err (!%p4399_p11)
}
 0x665   : > { %s4403_s12 = scalar_lea.hbm %s5851_s25, 64  ;;  %s4407_s18 = scalar_lea.hbm %s5897_s10, 256 }
 0x666   : > { %p4404_p1 = scmp.ne.s32.totalorder %s5851_s25, %s4403_s12  ;;  %p4408_p8 = scmp.lt.s32.totalorder %s5851_s25, %s5897_s10 }
 0x667   : > { %p4409_p9 = scmp.lt.s32.totalorder %s4407_s18, %s4403_s12 }
 0x668   : > { %p4405_p4 = pnand %p4404_p1, %p6030_p3 }
 0x669   : > { %p4410_p10 = por %p4409_p9, %p4408_p8 }
 0x66a   : > { %p4406_p6 = pneg %p4405_p4 }
 0x66c   : > { %p4411_p2 = pnand %p4410_p10, %p4406_p6 }
 0x66e   : > { %4414 = shalt.err (!%p4411_p2)
}
 0x66f   : > { %4103 = dma.vmem_to_hbm [thread:$0]  (%p6030_p3), %s3349_s5, 64, %s5851_s25, %s3335_s27  }
 0x670 PF: > { %p4135_p5 = scmp.ge.s32.totalorder %s4461_s16, 2  ;;  %s3360_s23 = sand.u32 1, %s4449_s13  }
 0x671   : > { %p6031_p7 = scmp.ne.s32.totalorder %s5927_s20, 0  ;;  %s3361_s19 = scalar_lea.sflag [#allocation4], %s3360_s23 }
 0x673   : > { %p4123_p12 = pnand %p4135_p5, %p6031_p7 }
 0x675   : > { %p4124_p13 = pneg %p4123_p12 }
 0x677   : > { %4444 = dma.done.wait (%p4124_p13), %s3361_s19, 64  }
 0x678   : > { %4446 = vsyncadd (%p4124_p13), %s3361_s19, 4294967232  ;;  %p25_p0 = scmp.ge.s32.totalorder %s4629_s28, 6   ;;  %s6032_s13 = smov %s4453_s14 }
 0x679   : > { %s6033_s14 = smov %s4457_s15  ;;  %s6034_s15 = smov %s4645_s11 }
 0x67a   : > { %s6035_s16 = smov %s4629_s28  ;;  %27 = sbr.rel (!%p25_p0) target bundleno = 12 (0xc), region = 121 }
 0x67f   :  { %3366 = vsyncpa [#allocation3], 1 }
 0x680   :  { %3368 = vsyncpa [#allocation3 + $0x1], 1 }
 0x681   :  { %3369 = vsyncpa [#allocation6], 1 }
 0x682   :  { %3370 = vsyncpa [#allocation9], 1 }
 0x683   :  { %3371 = vsyncpa [#allocation4], 1 }
 0x684   :  { %3373 = vsyncpa [#allocation4 + $0x1], 1 }

</bundles_post_ra>
